<compile_context>
chip_gen: v6e
topology: v6e:2x2x1
jax: 0.10.0
libtpu: 0.0.40
codegen_flags: <defaults>
</compile_context>

<pallas_src>
import functools

import jax
import jax.numpy as jnp
from jax.experimental import pallas as pl
from jax.experimental.pallas import tpu as pltpu

ARCH = [2, 128, 128, 128, 2]


def _round_up(x, m):
    return ((x + m - 1) // m) * m


def _resnet_kernel(xt_ref,
                   wt0_ref, bt0_ref,
                   wt1_ref, bt1_ref,
                   wt2_ref, bt2_ref,
                   wt3_ref, bt3_ref,
                   o_ref, *, n_steps):
    """One batch tile of out^T = x^T + MLP(x)^T, batch on the lane axis.

    xt_ref / o_ref: (2, TB) f32.  Weights are transposed (out, in); biases (out, 1).
    Elementwise dtype (ew) is carried by the biases/wt0/wt3; MXU operand dtype (mm) by
    wt1/wt2.  The wrapper picks (ew, mm) per chip generation.
    """
    f32 = jnp.float32

    wt0 = wt0_ref[...]            # (128, 2)   ew
    bt0 = bt0_ref[...]            # (128, 1)   ew
    wt1 = wt1_ref[...]            # (128, 128) mm (f32 or bf16)
    bt1 = bt1_ref[...]            # (128, 1)   ew
    wt2 = wt2_ref[...]            # (128, 128) mm
    bt2 = bt2_ref[...]            # (128, 1)   ew
    wt3 = wt3_ref[...]            # (2, 128)   ew
    bt3 = bt3_ref[...]            # (2, 1)     f32
    ew = bt0.dtype                # elementwise dtype (f32, or bf16 on v6e/v7x)
    mm = wt1.dtype                # MXU operand dtype (bf16 on all mixed/bf16 modes)

    def step(xt):                 # xt: (2, TB) f32, batch on lanes
        x_ew = xt.astype(ew)
        # Linear_0 (2 -> 128) on the VPU: two outer-product broadcast FMAs
        # (avoids a K=2 MXU matmul and its relayout).
        h = wt0[:, 0:1] * x_ew[0:1, :] + wt0[:, 1:2] * x_ew[1:2, :] + bt0   # (128, TB) ew
        h = jnp.maximum(h, 0.0)
        # Linear_1 / Linear_2 (128 -> 128) on the MXU with f32 accumulation; the f32
        # accumulator is cast to the elementwise dtype once, then bias + ReLU run in ew
        # and feed the next matmul directly (no extra per-layer cast pass in bf16 mode).
        # NOTE: (128,1)+(128,TB) bias adds lower to broadcast-operand vadds; verified
        # structure -- do not pre-materialize (128,TB) bias broadcasts.
        h = jnp.dot(wt1, h.astype(mm), preferred_element_type=f32)
        h = jnp.maximum(h.astype(ew) + bt1, 0.0)
        h = jnp.dot(wt2, h.astype(mm), preferred_element_type=f32)
        h = jnp.maximum(h.astype(ew) + bt2, 0.0)
        # Linear_3 (128 -> 2) + residual: f32 accumulation, f32 residual add, written
        # straight into the lane-dense slab.
        inc = jnp.dot(wt3, h.astype(wt3.dtype), preferred_element_type=f32) + bt3
        return xt + inc                                                     # (2, TB) f32

    xt = xt_ref[...].astype(f32)
    if n_steps <= 8:
        # Fully unrolled rollout: weights + state stay VMEM-resident and the scheduler
        # can overlap MXU pushes of one step with VPU work of its neighbours.
        out = xt
        for _ in range(n_steps):
            out = step(out)
    else:
        out = jax.lax.fori_loop(0, n_steps, lambda _, s: step(s), xt)
    o_ref[...] = out.astype(o_ref.dtype)


def _device_kind():
    try:
        return jax.devices()[0].device_kind.lower()
    except Exception:  # pragma: no cover
        return ""


def _resolve_precision(precision, kind):
    if precision != "auto":
        return precision
    if ("v6" in kind) or ("v7" in kind):
        return "bf16"        # bf16 MXU + bf16 VPU elementwise
    if ("v2" in kind) or ("v3" in kind) or ("v4" in kind) or ("v5" in kind):
        return "mixed"       # bf16 MXU, f32 elementwise (no bf16 VPU)
    return "f32"


def resnet_forward_t(xt, params, *, batch_tile=2048, n_steps=1, precision="auto",
                     vmem_limit_bytes=32 * 1024 * 1024):
    """Feature-major entry point: xt is (n_dim, B); returns (n_dim, B).

    Computes x + MLP(x), applied `n_steps` times, in a single pallas_call.
    precision: "auto" | "f32" | "mixed" (bf16 MXU, f32 elementwise) | "bf16".
    batch_tile: samples per grid step, rounded to a multiple of 128 (keep <= ~4096 so
      the live (128, TB) temporaries fit scoped VMEM on every generation).
    """
    n_dim, B = xt.shape
    assert len(params) == 4, "kernel is specialized to arch [2, 128, 128, 128, 2]"
    assert n_dim == params[0][0].shape[0] == params[-1][0].shape[1]

    kind = _device_kind()
    precision = _resolve_precision(precision, kind)
    if precision == "f32":
        ew, mm = jnp.float32, jnp.float32
    elif precision == "mixed":
        ew, mm = jnp.float32, jnp.bfloat16
    elif precision == "bf16":
        ew, mm = jnp.bfloat16, jnp.bfloat16
    else:
        raise ValueError(f"unknown precision {precision!r}")

    # Batch tile: one big lane-dense tile on single-TC chips; on v7x split into >= 2
    # "parallel" grid steps so both TensorCores get work.
    min_grid = 2 if ("v7" in kind and B > 128) else 1
    tb = _round_up(max(batch_tile, 128), 128)
    tb = min(tb, _round_up(-(-B // min_grid), 128))
    b_pad = _round_up(B, tb)

    x32 = xt.astype(jnp.float32)
    if b_pad != B:
        # Padded columns compute MLP(0) != 0 (biases propagate); harmless -- sliced off
        # below.  Do NOT add a masked zeroing pass for them.
        x32 = jnp.zeros((n_dim, b_pad), jnp.float32).at[:, :B].set(x32)

    (w0, b0), (w1, b1), (w2, b2), (w3, b3) = params
    wt0 = jnp.transpose(w0).astype(ew)                 # (128, 2)
    bt0 = jnp.reshape(b0, (-1, 1)).astype(ew)          # (128, 1)
    wt1 = jnp.transpose(w1).astype(mm)                 # (128, 128)
    bt1 = jnp.reshape(b1, (-1, 1)).astype(ew)
    wt2 = jnp.transpose(w2).astype(mm)                 # (128, 128)
    bt2 = jnp.reshape(b2, (-1, 1)).astype(ew)
    wt3 = jnp.transpose(w3).astype(ew)                 # (2, 128)
    bt3 = jnp.reshape(b3, (-1, 1)).astype(jnp.float32) # (2, 1)  f32 (residual side)
    flat = [wt0, bt0, wt1, bt1, wt2, bt2, wt3, bt3]

    in_specs = [pl.BlockSpec((n_dim, tb), lambda i: (0, i))]
    for arr in flat:
        # Full arrays, constant index_map -> VMEM-resident for every grid step.
        in_specs.append(pl.BlockSpec(arr.shape, lambda i: (0, 0)))
    out_spec = pl.BlockSpec((n_dim, tb), lambda i: (0, i))

    out_t = pl.pallas_call(
        functools.partial(_resnet_kernel, n_steps=n_steps),
        out_shape=jax.ShapeDtypeStruct((n_dim, b_pad), jnp.float32),
        grid_spec=pltpu.PrefetchScalarGridSpec(
            num_scalar_prefetch=0,
            grid=(b_pad // tb,),
            in_specs=in_specs,
            out_specs=out_spec,
        ),
        compiler_params=pltpu.CompilerParams(
            dimension_semantics=("parallel",),
            vmem_limit_bytes=vmem_limit_bytes),
    )(x32, *flat)

    return out_t[:, :B]


def resnet_forward(x, params, **kwargs):
    """Batch-major convenience wrapper: x (B, n_dim) -> (B, n_dim).

    For repeated calls / fused pipelines, prefer resnet_forward_t with feature-major
    state to avoid the transpose round trips.
    """
    out_t = resnet_forward_t(jnp.transpose(x), params, **kwargs)
    return jnp.transpose(out_t)


def init_params(key, arch=ARCH):
    """Deterministic init mimicking torch.nn.Linear default U(-1/sqrt(fan_in), +)."""
    params = []
    for i in range(len(arch) - 1):
        fan_in, fan_out = arch[i], arch[i + 1]
        key, kw, kb = jax.random.split(key, 3)
        bound = 1.0 / jnp.sqrt(fan_in)
        w = jax.random.uniform(kw, (fan_in, fan_out), jnp.float32, -bound, bound)
        b = jax.random.uniform(kb, (1, fan_out), jnp.float32, -bound, bound)
        params.append((w, b))
    return params


def resnet_forward_ref(x, params, n_steps=1):
    """Pure-JAX reference of ResNet.forward (iterated n_steps times)."""
    out = x
    n = len(params)
    for _ in range(n_steps):
        h = out
        for i, (w, b) in enumerate(params):
            h = h @ w + b
            if i < n - 1:
                h = jnp.maximum(h, 0.0)
        out = out + h
    return out


if __name__ == "__main__":
    key = jax.random.PRNGKey(0)
    kx, kp = jax.random.split(key)

    batch = 320                      # batch_size from the original training script
    n_dim = ARCH[0]                  # 2 (Hyperbolic system state dim)

    x = jax.random.normal(kx, (batch, n_dim), dtype=jnp.float32)
    params = init_params(kp)
    ref = resnet_forward_ref(x, params)

    # 1) Exact-semantics check: full f32, one lane-dense batch tile.
    out = jax.block_until_ready(resnet_forward(x, params, precision="f32"))
    assert out.shape == (batch, n_dim)
    assert jnp.allclose(out, ref, atol=1e-4, rtol=1e-4), "f32 single-tile mismatch"

    # 2) Multi-tile grid (exercises batch padding + multiple 'parallel' steps).
    out2 = jax.block_until_ready(
        resnet_forward(x, params, precision="f32", batch_tile=128))
    assert jnp.allclose(out2, ref, atol=1e-4, rtol=1e-4), "f32 tiled-grid mismatch"

    # 3) Chip-tuned fast path (bf16 MXU everywhere; bf16 elementwise on v6e/v7x).
    out3 = jax.block_until_ready(resnet_forward(x, params, precision="auto"))
    assert jnp.allclose(out3, ref, atol=5e-2, rtol=5e-2), "auto-precision mismatch"

    # 4) bf16-MXU / f32-elementwise mode (the v5e-style path) on any chip.
    out4 = jax.block_until_ready(resnet_forward(x, params, precision="mixed"))
    assert jnp.allclose(out4, ref, atol=5e-2, rtol=5e-2), "mixed-precision mismatch"

    # 5) Fused, fully unrolled 4-step rollout x_{t+1} = x_t + MLP(x_t) in one launch.
    ref5 = resnet_forward_ref(x, params, n_steps=4)
    out5 = jax.block_until_ready(
        resnet_forward(x, params, precision="auto", n_steps=4))
    assert jnp.allclose(out5, ref5, atol=1e-1, rtol=1e-1), "rollout mismatch"

    print("KERNEL_OK")
</pallas_src>

<mosaic_0001>
module attributes {stable_mosaic.version = 11 : i64} {
  func.func @_resnet_kernel(%arg0: i32, %arg1: memref<2x384xf32, #tpu.memory_space<vmem>>, %arg2: memref<128x2xf32, #tpu.memory_space<vmem>>, %arg3: memref<128x1xf32, #tpu.memory_space<vmem>>, %arg4: memref<128x128xf32, #tpu.memory_space<vmem>>, %arg5: memref<128x1xf32, #tpu.memory_space<vmem>>, %arg6: memref<128x128xf32, #tpu.memory_space<vmem>>, %arg7: memref<128x1xf32, #tpu.memory_space<vmem>>, %arg8: memref<2x128xf32, #tpu.memory_space<vmem>>, %arg9: memref<2x1xf32, #tpu.memory_space<vmem>>, %arg10: memref<2x384xf32, #tpu.memory_space<vmem>>) attributes {dimension_semantics = [#tpu.dimension_semantics<parallel>], iteration_bounds = array<i64: 1>, scalar_prefetch = 0 : i64, scratch_operands = 0 : i64, tpu.core_type = #tpu.core_type<tc>, window_params = [{transform_indices = @transform_0, window_bounds = array<i64: 2, 384>}, {pipeline_mode = #tpu.pipeline_mode<synchronous>, transform_indices = @transform_1, window_bounds = array<i64: 128, 2>}, {pipeline_mode = #tpu.pipeline_mode<synchronous>, transform_indices = @transform_2, window_bounds = array<i64: 128, 1>}, {pipeline_mode = #tpu.pipeline_mode<synchronous>, transform_indices = @transform_3, window_bounds = array<i64: 128, 128>}, {pipeline_mode = #tpu.pipeline_mode<synchronous>, transform_indices = @transform_4, window_bounds = array<i64: 128, 1>}, {pipeline_mode = #tpu.pipeline_mode<synchronous>, transform_indices = @transform_5, window_bounds = array<i64: 128, 128>}, {pipeline_mode = #tpu.pipeline_mode<synchronous>, transform_indices = @transform_6, window_bounds = array<i64: 128, 1>}, {pipeline_mode = #tpu.pipeline_mode<synchronous>, transform_indices = @transform_7, window_bounds = array<i64: 2, 128>}, {pipeline_mode = #tpu.pipeline_mode<synchronous>, transform_indices = @transform_8, window_bounds = array<i64: 2, 1>}, {transform_indices = @transform_9, window_bounds = array<i64: 2, 384>}]} {
    %c0 = arith.constant 0 : index
    %c0_0 = arith.constant 0 : index
    %0 = vector.load %arg2[%c0, %c0_0] : memref<128x2xf32, #tpu.memory_space<vmem>>, vector<128x2xf32>
    %c0_1 = arith.constant 0 : index
    %c0_2 = arith.constant 0 : index
    %1 = vector.load %arg3[%c0_1, %c0_2] : memref<128x1xf32, #tpu.memory_space<vmem>>, vector<128x1xf32>
    %c0_3 = arith.constant 0 : index
    %c0_4 = arith.constant 0 : index
    %2 = vector.load %arg4[%c0_3, %c0_4] : memref<128x128xf32, #tpu.memory_space<vmem>>, vector<128x128xf32>
    %c0_5 = arith.constant 0 : index
    %c0_6 = arith.constant 0 : index
    %3 = vector.load %arg5[%c0_5, %c0_6] : memref<128x1xf32, #tpu.memory_space<vmem>>, vector<128x1xf32>
    %c0_7 = arith.constant 0 : index
    %c0_8 = arith.constant 0 : index
    %4 = vector.load %arg6[%c0_7, %c0_8] : memref<128x128xf32, #tpu.memory_space<vmem>>, vector<128x128xf32>
    %c0_9 = arith.constant 0 : index
    %c0_10 = arith.constant 0 : index
    %5 = vector.load %arg7[%c0_9, %c0_10] : memref<128x1xf32, #tpu.memory_space<vmem>>, vector<128x1xf32>
    %c0_11 = arith.constant 0 : index
    %c0_12 = arith.constant 0 : index
    %6 = vector.load %arg8[%c0_11, %c0_12] : memref<2x128xf32, #tpu.memory_space<vmem>>, vector<2x128xf32>
    %c0_13 = arith.constant 0 : index
    %c0_14 = arith.constant 0 : index
    %7 = vector.load %arg9[%c0_13, %c0_14] : memref<2x1xf32, #tpu.memory_space<vmem>>, vector<2x1xf32>
    %c0_15 = arith.constant 0 : index
    %c0_16 = arith.constant 0 : index
    %8 = vector.load %arg1[%c0_15, %c0_16] : memref<2x384xf32, #tpu.memory_space<vmem>>, vector<2x384xf32>
    %9 = vector.extract_strided_slice %0 {offsets = [0, 0], sizes = [128, 1], strides = [1, 1]} : vector<128x2xf32> to vector<128x1xf32>
    %10 = vector.extract_strided_slice %8 {offsets = [0, 0], sizes = [1, 384], strides = [1, 1]} : vector<2x384xf32> to vector<1x384xf32>
    %11 = vector.broadcast %9 : vector<128x1xf32> to vector<128x384xf32>
    %12 = vector.broadcast %10 : vector<1x384xf32> to vector<128x384xf32>
    %13 = arith.mulf %11, %12 : vector<128x384xf32>
    %14 = vector.extract_strided_slice %0 {offsets = [0, 1], sizes = [128, 1], strides = [1, 1]} : vector<128x2xf32> to vector<128x1xf32>
    %15 = vector.extract_strided_slice %8 {offsets = [1, 0], sizes = [1, 384], strides = [1, 1]} : vector<2x384xf32> to vector<1x384xf32>
    %16 = vector.broadcast %14 : vector<128x1xf32> to vector<128x384xf32>
    %17 = vector.broadcast %15 : vector<1x384xf32> to vector<128x384xf32>
    %18 = arith.mulf %16, %17 : vector<128x384xf32>
    %19 = arith.addf %13, %18 : vector<128x384xf32>
    %20 = vector.broadcast %1 : vector<128x1xf32> to vector<128x384xf32>
    %21 = arith.addf %19, %20 : vector<128x384xf32>
    %cst = arith.constant 0.000000e+00 : f32
    %22 = vector.broadcast %cst : f32 to vector<128x384xf32>
    %23 = arith.maximumf %21, %22 : vector<128x384xf32>
    %cst_17 = arith.constant dense<0.000000e+00> : vector<128x384xf32>
    %24 = tpu.matmul %2, %23, %cst_17 {dimension_numbers = #tpu.dot_dimension_numbers<[1], [0], [0], [1], [0, 0, 1, 1], [], []>} : vector<128x128xf32>, vector<128x384xf32>, vector<128x384xf32> -> vector<128x384xf32>
    %25 = vector.broadcast %3 : vector<128x1xf32> to vector<128x384xf32>
    %26 = arith.addf %24, %25 : vector<128x384xf32>
    %cst_18 = arith.constant 0.000000e+00 : f32
    %27 = vector.broadcast %cst_18 : f32 to vector<128x384xf32>
    %28 = arith.maximumf %26, %27 : vector<128x384xf32>
    %cst_19 = arith.constant dense<0.000000e+00> : vector<128x384xf32>
    %29 = tpu.matmul %4, %28, %cst_19 {dimension_numbers = #tpu.dot_dimension_numbers<[1], [0], [0], [1], [0, 0, 1, 1], [], []>} : vector<128x128xf32>, vector<128x384xf32>, vector<128x384xf32> -> vector<128x384xf32>
    %30 = vector.broadcast %5 : vector<128x1xf32> to vector<128x384xf32>
    %31 = arith.addf %29, %30 : vector<128x384xf32>
    %cst_20 = arith.constant 0.000000e+00 : f32
    %32 = vector.broadcast %cst_20 : f32 to vector<128x384xf32>
    %33 = arith.maximumf %31, %32 : vector<128x384xf32>
    %cst_21 = arith.constant dense<0.000000e+00> : vector<2x384xf32>
    %34 = tpu.matmul %6, %33, %cst_21 {dimension_numbers = #tpu.dot_dimension_numbers<[1], [0], [0], [1], [0, 0, 1, 1], [], []>} : vector<2x128xf32>, vector<128x384xf32>, vector<2x384xf32> -> vector<2x384xf32>
    %35 = vector.broadcast %7 : vector<2x1xf32> to vector<2x384xf32>
    %36 = arith.addf %34, %35 : vector<2x384xf32>
    %37 = arith.addf %8, %36 : vector<2x384xf32>
    %c0_22 = arith.constant 0 : index
    %c0_23 = arith.constant 0 : index
    %38 = vector.load %arg10[%c0_22, %c0_23] : memref<2x384xf32, #tpu.memory_space<vmem>>, vector<2x384xf32>
    tpu.vector_store %arg10[%c0_22, %c0_23], %37 {strides = array<i32>} : memref<2x384xf32, #tpu.memory_space<vmem>>, vector<2x384xf32>,
    return
  }
  func.func @transform_0(%arg0: i32) -> (i32, i32) {
    %c0_i32 = arith.constant 0 : i32
    %c0_i32_0 = arith.constant 0 : i32
    return %c0_i32, %arg0 : i32, i32
  }
  func.func @transform_1(%arg0: i32) -> (i32, i32) {
    %c0_i32 = arith.constant 0 : i32
    %c0_i32_0 = arith.constant 0 : i32
    %c0_i32_1 = arith.constant 0 : i32
    return %c0_i32, %c0_i32_0 : i32, i32
  }
  func.func @transform_2(%arg0: i32) -> (i32, i32) {
    %c0_i32 = arith.constant 0 : i32
    %c0_i32_0 = arith.constant 0 : i32
    %c0_i32_1 = arith.constant 0 : i32
    return %c0_i32, %c0_i32_0 : i32, i32
  }
  func.func @transform_3(%arg0: i32) -> (i32, i32) {
    %c0_i32 = arith.constant 0 : i32
    %c0_i32_0 = arith.constant 0 : i32
    %c0_i32_1 = arith.constant 0 : i32
    return %c0_i32, %c0_i32_0 : i32, i32
  }
  func.func @transform_4(%arg0: i32) -> (i32, i32) {
    %c0_i32 = arith.constant 0 : i32
    %c0_i32_0 = arith.constant 0 : i32
    %c0_i32_1 = arith.constant 0 : i32
    return %c0_i32, %c0_i32_0 : i32, i32
  }
  func.func @transform_5(%arg0: i32) -> (i32, i32) {
    %c0_i32 = arith.constant 0 : i32
    %c0_i32_0 = arith.constant 0 : i32
    %c0_i32_1 = arith.constant 0 : i32
    return %c0_i32, %c0_i32_0 : i32, i32
  }
  func.func @transform_6(%arg0: i32) -> (i32, i32) {
    %c0_i32 = arith.constant 0 : i32
    %c0_i32_0 = arith.constant 0 : i32
    %c0_i32_1 = arith.constant 0 : i32
    return %c0_i32, %c0_i32_0 : i32, i32
  }
  func.func @transform_7(%arg0: i32) -> (i32, i32) {
    %c0_i32 = arith.constant 0 : i32
    %c0_i32_0 = arith.constant 0 : i32
    %c0_i32_1 = arith.constant 0 : i32
    return %c0_i32, %c0_i32_0 : i32, i32
  }
  func.func @transform_8(%arg0: i32) -> (i32, i32) {
    %c0_i32 = arith.constant 0 : i32
    %c0_i32_0 = arith.constant 0 : i32
    %c0_i32_1 = arith.constant 0 : i32
    return %c0_i32, %c0_i32_0 : i32, i32
  }
  func.func @transform_9(%arg0: i32) -> (i32, i32) {
    %c0_i32 = arith.constant 0 : i32
    %c0_i32_0 = arith.constant 0 : i32
    return %c0_i32, %arg0 : i32, i32
  }
}

</mosaic_0001>

<bundles_post_ra>
// kernel: tpu_custom_call.1
= control target key start
LH: loop header
LB: loop body
LE: loop exit
PB: predicated region body
PF: predicated region fallthrough
CT: control target
= control target key end

     0   :  { %v1977_v2 = vmov 1   ;;  %v1978_v3 = vmov 0   ;;  %s2980_s0 = inlined_call_operand.vmem [shape: f32[2,384], index: 0, kind: input, shape index: {}]   ;;  %s2981_s1 = inlined_call_operand.vmem [shape: f32[128,2], index: 1, kind: input, shape index: {}]   ;;  %s2982_s2 = inlined_call_operand.vmem [shape: f32[128,1], index: 2, kind: input, shape index: {}]   ;;  %s2983_s3 = inlined_call_operand.vmem [shape: f32[128,128], index: 3, kind: input, shape index: {}]   ;;  %s2984_s4 = inlined_call_operand.vmem [shape: f32[128,1], index: 4, kind: input, shape index: {}]   ;;  %s2985_s5 = inlined_call_operand.vmem [shape: f32[128,128], index: 5, kind: input, shape index: {}]   ;;  %s2986_s6 = inlined_call_operand.vmem [shape: f32[128,1], index: 6, kind: input, shape index: {}]   ;;  %s2987_s7 = inlined_call_operand.vmem [shape: f32[2,128], index: 7, kind: input, shape index: {}]   ;;  %s2988_s8 = inlined_call_operand.vmem [shape: f32[2,1], index: 8, kind: input, shape index: {}]   ;;  %s2989_s9 = inlined_call_operand.hbm [shape: f32[2,384], index: 9, kind: output, shape index: {}]  }
   0x1   :  { %v48_v0 = vld [vmem:[%s2981_s1 + $0x78] sm:$0xff]  ;;  %v47_v1 = vld [vmem:[%s2981_s1 + $0x70] sm:$0xff]  ;;  %1935 = vset.pattern.permute.xlu0 %v1977_v2  ;;  %1936 = vset.pattern.permute.xlu1 %v1978_v3  ;;  %v46_v4 = vld [vmem:[%s2981_s1 + $0x68] sm:$0xff] }
   0x2   :  { %349 = vperm.xlu0 %1935, %v48_v0   ;;  %204 = vperm.xlu1 %1936, %v47_v1   ;;  %v43_v5 = vld [vmem:[%s2981_s1 + $0x50] sm:$0xff]  ;;  %v42_v6 = vld [vmem:[%s2981_s1 + $0x48] sm:$0xff]  ;;  %v64_v7 = vld [vmem:[%s2982_s2 + $0x78] sm:$0xff] }
   0x3   :  { %v39_v8 = vld [vmem:[%s2981_s1 + $0x30] sm:$0xff]  ;;  %v45_v9 = vld [vmem:[%s2981_s1 + $0x60] sm:$0xff] }
   0x6   :  { %1937 = vset.pattern.permute.xlu1 %v1977_v2  ;;  %341 = vperm.xlu0 %1935, %v46_v4  }
   0x7   :  { %345 = vperm.xlu1 %1937, %v47_v1  }
   0xa   :  { %329 = vperm.xlu0 %1935, %v43_v5  }
   0xb   :  { %1938 = vset.pattern.permute.xlu1 %v1978_v3 }
   0xc   :  { %199 = vperm.xlu1 %1938, %v46_v4  }
   0xe   :  { %325 = vperm.xlu0 %1935, %v42_v6  }
  0x10   :  { %552 = vperm.xlu1 %1938, %v64_v7  }
  0x12   :  { %313 = vperm.xlu0 %1935, %v39_v8  }
  0x13   :  { %14 = vsyncpa [#allocation3], 0  ;;  %v38_v10 = vld [vmem:[%s2981_s1 + $0x28] sm:$0xff]  ;;  %v63_v11 = vld [vmem:[%s2982_s2 + $0x70] sm:$0xff]  ;;  %v1979_v51 = vmov 0.0   ;;  %v213_v60 = vlaneseq  ;;  %vm1980_vm0 = vmmov 0  }
  0x14   :  { %1939 = vset.pattern.permute.xlu1 %v1977_v2  ;;  %v2071_v12 = vld [vmem:[%s2981_s1 + $0x10] sm:$0xff]  ;;  %v2078_v13 = vld [vmem:[%s2981_s1 + $0x8] sm:$0xff]  ;;  %v44_v14 = vld [vmem:[%s2981_s1 + $0x58] sm:$0xff]  ;;  %795 = vmatprep.mubr.f32.mxu0 %v1979_v51 }
  0x15   :  { %337 = vperm.xlu1 %1939, %v45_v9   ;;  %v61_v15 = vld [vmem:[%s2982_s2 + $0x60] sm:$0xff]  ;;  %v62_v16 = vld [vmem:[%s2982_s2 + $0x68] sm:$0xff]  ;;  %v60_v17 = vld [vmem:[%s2982_s2 + $0x58] sm:$0xff]  ;;  %v2237_v1 = vshrl.u32 %v213_v60, 7 }
  0x16   :  { %309 = vperm.xlu0 %1935, %v38_v10   ;;  %v41_v18 = vld [vmem:[%s2981_s1 + $0x40] sm:$0xff]  ;;  %v40_v19 = vld [vmem:[%s2981_s1 + $0x38] sm:$0xff]  ;;  %v59_v20 = vld [vmem:[%s2982_s2 + $0x50] sm:$0xff] }
  0x17   :  { %v58_v21 = vld [vmem:[%s2982_s2 + $0x48] sm:$0xff]  ;;  %v37_v22 = vld [vmem:[%s2981_s1 + $0x20] sm:$0xff]  ;;  %v36_v23 = vld [vmem:[%s2981_s1 + $0x18] sm:$0xff]  ;;  %v354_v4 = vsub.s32 1, %v2237_v1 }
  0x18   :  { %v54_v24 = vld [vmem:[%s2982_s2 + $0x28] sm:$0xff]  ;;  %v57_v25 = vld [vmem:[%s2982_s2 + $0x40] sm:$0xff]  ;;  %v56_v28 = vld [vmem:[%s2982_s2 + $0x38] sm:$0xff] }
  0x19   :  { %1940 = vset.pattern.permute.xlu1 %v1978_v3  ;;  %v33_v26 = vld [vmem:[%s2981_s1] sm:$0xff]  ;;  %v50_v27 = vld [vmem:[%s2982_s2 + $0x8] sm:$0xff]  ;;  %v96_v29 = vld [vmem:[%s2984_s4 + $0x78] sm:$0xff] }
  0x1a   :  { %547 = vperm.xlu1 %1940, %v63_v11   ;;  %297 = vperm.xlu0 %1935, %v2071_v12   ;;  %v94_v30 = vld [vmem:[%s2984_s4 + $0x68] sm:$0xff]  ;;  %v55_v31 = vld [vmem:[%s2982_s2 + $0x30] sm:$0xff]  ;;  %v92_v32 = vld [vmem:[%s2984_s4 + $0x58] sm:$0xff] }
  0x1b   :  { %v90_v33 = vld [vmem:[%s2984_s4 + $0x48] sm:$0xff]  ;;  %v88_v34 = vld [vmem:[%s2984_s4 + $0x38] sm:$0xff]  ;;  %v53_v36 = vld [vmem:[%s2982_s2 + $0x20] sm:$0xff] }
  0x1c   :  { %v86_v35 = vld [vmem:[%s2984_s4 + $0x28] sm:$0xff]  ;;  %v84_v37 = vld [vmem:[%s2984_s4 + $0x18] sm:$0xff]  ;;  %v51_v42 = vld [vmem:[%s2982_s2 + $0x10] sm:$0xff] }
  0x1d   :  { %v82_v38 = vld [vmem:[%s2984_s4 + $0x8] sm:$0xff]  ;;  %v52_v39 = vld [vmem:[%s2982_s2 + $0x18] sm:$0xff]  ;;  %v49_v44 = vld [vmem:[%s2982_s2] sm:$0xff] }
  0x1e   :  { %1941 = vset.pattern.permute.xlu1 %v1977_v2  ;;  %293 = vperm.xlu0 %1935, %v2078_v13   ;;  %v128_v40 = vld [vmem:[%s2986_s6 + $0x78] sm:$0xff]  ;;  %v126_v41 = vld [vmem:[%s2986_s6 + $0x68] sm:$0xff]  ;;  %v95_v48 = vld [vmem:[%s2984_s4 + $0x70] sm:$0xff] }
  0x1f   :  { %333 = vperm.xlu1 %1941, %v44_v14   ;;  %v124_v43 = vld [vmem:[%s2986_s6 + $0x58] sm:$0xff]  ;;  %v122_v45 = vld [vmem:[%s2986_s6 + $0x48] sm:$0xff]  ;;  %v2202_v49 = vld [vmem:[%s2983_s3] sm:$0xff] }
  0x20   :  { %v120_v50 = vld [vmem:[%s2986_s6 + $0x38] sm:$0xff]  ;;  %1814 = vmatprep.mubr.f32.mxu1 %v2202_v49  ;;  %v93_v54 = vld [vmem:[%s2984_s4 + $0x60] sm:$0xff]  ;;  %v118_v55 = vld [vmem:[%s2986_s6 + $0x28] sm:$0xff] }
  0x21   :  { %v91_v58 = vld [vmem:[%s2984_s4 + $0x50] sm:$0xff]  ;;  %v116_v59 = vld [vmem:[%s2986_s6 + $0x18] sm:$0xff]  ;;  %v89_v63 = vld [vmem:[%s2984_s4 + $0x40] sm:$0xff] }
  0x22   :  { %1951 = vset.pattern.permute.xlu0 %v1978_v3  ;;  %v131_v11 = vld [vmem:[%s2980_s0] sm:$0x3f] }
  0x23   :  { %1942 = vset.pattern.permute.xlu1 %v1978_v3  ;;  %209 = vperm.xlu0 %1951, %v48_v0   ;;  %v114_v0 = vld [vmem:[%s2986_s6 + $0x8] sm:$0xff] }
  0x24   :  { %184 = vperm.xlu1 %1942, %v43_v5   ;;  %v358_v5 = vsub.s32 3, %v2237_v1 }
  0x27   :  { %194 = vperm.xlu0 %1951, %v45_v9   ;;  %v215_v9 = vsub.s32 0, %v2237_v1 }
  0x28   :  { %537 = vperm.xlu1 %1942, %v61_v15   ;;  %v355_v15 = vrot.slane %v131_v11, %v354_v4 }
  0x2b   :  { %189 = vperm.xlu0 %1951, %v44_v14   ;;  %v85_v14 = vld [vmem:[%s2984_s4 + $0x20] sm:$0xff] }
  0x2c   :  { %179 = vperm.xlu1 %1942, %v42_v6   ;;  %v362_v6 = vsub.s32 5, %v2237_v1 }
  0x2f   :  { %542 = vperm.xlu0 %1951, %v62_v16   ;;  %v359_v16 = vrot.slane %v131_v11, %v358_v5 }
  0x30   :  { %532 = vperm.xlu1 %1942, %v60_v17   ;;  %v363_v17 = vrot.slane %v131_v11, %v362_v6 }
  0x33   :  { %174 = vperm.xlu0 %1951, %v41_v18  }
  0x34   :  { %1943 = vset.pattern.permute.xlu1 %v1977_v2 }
  0x35   :  { %321 = vperm.xlu1 %1943, %v41_v18   ;;  %v216_v18 = vrot.slane %v131_v11, %v215_v9 }
  0x37   :  { %169 = vperm.xlu0 %1951, %v40_v19  }
  0x39   :  { %1944 = vset.pattern.permute.xlu1 %v1978_v3 }
  0x3a   :  { %527 = vperm.xlu1 %1944, %v59_v20  }
  0x3b   :  { %522 = vperm.xlu0 %1951, %v58_v21  }
  0x3e   :  { %1945 = vset.pattern.permute.xlu1 %v1977_v2 }
  0x3f   :  { %317 = vperm.xlu1 %1945, %v40_v19   ;;  %154 = vperm.xlu0 %1951, %v37_v22  }
  0x43   :  { %1946 = vset.pattern.permute.xlu1 %v1978_v3  ;;  %149 = vperm.xlu0 %1951, %v36_v23  }
  0x44   :  { %164 = vperm.xlu1 %1946, %v39_v8   ;;  %v130_v8 = vld [vmem:[%s2988_s8] sm:$0x3] }
  0x47   :  { %502 = vperm.xlu0 %1951, %v54_v24   ;;  %v2268_v24 = vrot.slane %v355_v15, %v354_v4 }
  0x48   :  { %517 = vperm.xlu1 %1946, %v57_v25   ;;  %v2270_v25 = vrot.slane %v359_v16, %v354_v4 }
  0x4b   :  { %134 = vperm.xlu0 %1951, %v33_v26  }
  0x4c   :  { %159 = vperm.xlu1 %1946, %v38_v10  }
  0x4f   :  { %482 = vperm.xlu0 %1951, %v50_v27   ;;  %v2274_v27 = vrot.slane %v216_v18, %v215_v9 }
  0x50   :  { %512 = vperm.xlu1 %1946, %v56_v28  }
  0x53   :  { %728 = vperm.xlu0 %1951, %v96_v29  }
  0x54   :  { %1947 = vset.pattern.permute.xlu1 %v1977_v2 }
  0x55   :  { %305 = vperm.xlu1 %1947, %v37_v22  }
  0x57   :  { %718 = vperm.xlu0 %1951, %v94_v30  }
  0x59   :  { %1948 = vset.pattern.permute.xlu1 %v1978_v3 }
  0x5a   :  { %507 = vperm.xlu1 %1948, %v55_v31  }
  0x5b   :  { %708 = vperm.xlu0 %1951, %v92_v32   ;;  %v81_v32 = vld [vmem:[%s2984_s4] sm:$0xff] }
  0x5e   :  { %1949 = vset.pattern.permute.xlu1 %v1977_v2 }
  0x5f   :  { %301 = vperm.xlu1 %1949, %v36_v23   ;;  %698 = vperm.xlu0 %1951, %v90_v33   ;;  %v83_v23 = vld [vmem:[%s2984_s4 + $0x10] sm:$0xff] }
  0x63   :  { %1950 = vset.pattern.permute.xlu1 %v1978_v3  ;;  %688 = vperm.xlu0 %1951, %v88_v34  }
  0x64   :  { %144 = vperm.xlu1 %1950, %v2071_v12   ;;  %v219_v12 = vsub.s32 2, %v2237_v1 }
  0x66   :  { %v220_v21 = vrot.slane %v131_v11, %v219_v12 }
  0x67   :  { %678 = vperm.xlu0 %1951, %v86_v35  }
  0x68   :  { %497 = vperm.xlu1 %1950, %v53_v36   ;;  %v2278_v29 = vrot.slane %v220_v21, %v215_v9 }
  0x6b   :  { %668 = vperm.xlu0 %1951, %v84_v37  }
  0x6c   :  { %139 = vperm.xlu1 %1950, %v2078_v13   ;;  %v223_v13 = vsub.s32 4, %v2237_v1 }
  0x6e   :  { %v224_v22 = vrot.slane %v131_v11, %v223_v13 }
  0x6f   :  { %658 = vperm.xlu0 %1951, %v82_v38  }
  0x70   :  { %492 = vperm.xlu1 %1950, %v52_v39   ;;  %v2280_v30 = vrot.slane %v224_v22, %v215_v9 }
  0x73   :  { %1162 = vperm.xlu0 %1951, %v128_v40  }
  0x74   :  { %1952 = vset.pattern.permute.xlu1 %v1977_v2 }
  0x75   :  { %289 = vperm.xlu1 %1952, %v33_v26   ;;  %v2272_v26 = vrot.slane %v363_v17, %v354_v4 }
  0x77   :  { %1152 = vperm.xlu0 %1951, %v126_v41  }
  0x79   :  { %1953 = vset.pattern.permute.xlu1 %v1978_v3  ;;  %v87_v3 = vld [vmem:[%s2984_s4 + $0x30] sm:$0xff] }
  0x7a   :  { %487 = vperm.xlu1 %1953, %v51_v42  }
  0x7b   :  { %1142 = vperm.xlu0 %1951, %v124_v43  }
  0x7d   :  { %v2192_v46 = vpop.permute.xlu1 %204  ;;  %v2194_v47 = vpop.permute.xlu0 %349 }
  0x7e   :  { %477 = vperm.xlu1 %1953, %v49_v44   ;;  %v282_v36 = vmul.f32 %v2274_v27, %v2192_v46  ;;  %v424_v37 = vmul.f32 %v2268_v24, %v2194_v47  ;;  %v425_v38 = vmul.f32 %v2270_v25, %v2194_v47  ;;  %v426_v39 = vmul.f32 %v2272_v26, %v2194_v47 }
  0x7f   :  { %1132 = vperm.xlu0 %1951, %v122_v45   ;;  %v283_v40 = vmul.f32 %v2278_v29, %v2192_v46  ;;  %v284_v41 = vmul.f32 %v2280_v30, %v2192_v46  ;;  %v127_v46 = vld [vmem:[%s2986_s6 + $0x70] sm:$0xff] }
  0x81   :  { %v2209_v52 = vpop.permute.xlu0 %341 }
  0x82   :  { %v346_v53 = vpop.permute.xlu1 %345  ;;  %723 = vperm.xlu1 %1953, %v95_v48   ;;  %v418_v42 = vmul.f32 %v2268_v24, %v2209_v52  ;;  %v419_v45 = vmul.f32 %v2270_v25, %v2209_v52 }
  0x83   :  { %1122 = vperm.xlu0 %1951, %v120_v50   ;;  %v421_v33 = vmul.f32 %v2268_v24, %v346_v53  ;;  %v422_v34 = vmul.f32 %v2270_v25, %v346_v53  ;;  %v423_v35 = vmul.f32 %v2272_v26, %v346_v53 }
  0x85   :  { %v2217_v56 = vpop.permute.xlu0 %329 }
  0x86   :  { %713 = vperm.xlu1 %1953, %v93_v54   ;;  %v420_v54 = vmul.f32 %v2272_v26, %v2209_v52 }
  0x87   :  { %v2219_v57 = vpop.permute.xlu1 %199  ;;  %1112 = vperm.xlu0 %1951, %v118_v55   ;;  %v469_v55 = vadd.f32 %v421_v33, %v282_v36 }
  0x88   :  { %v279_v43 = vmul.f32 %v2274_v27, %v2219_v57  ;;  %v280_v60 = vmul.f32 %v2278_v29, %v2219_v57  ;;  %v281_v4 = vmul.f32 %v2280_v30, %v2219_v57 }
  0x89   :  { %v2227_v61 = vpop.permute.xlu0 %325 }
  0x8a   :  { %703 = vperm.xlu1 %1953, %v91_v58   ;;  %v470_v58 = vadd.f32 %v422_v34, %v283_v40  ;;  %v466_v9 = vadd.f32 %v418_v42, %v279_v43 }
  0x8b   :  { %v2229_v62 = vpop.permute.xlu1 %552  ;;  %1102 = vperm.xlu0 %1951, %v116_v59   ;;  %v471_v59 = vadd.f32 %v423_v35, %v284_v41 }
  0x8d   :  { %v2239_v2 = vpop.permute.xlu0 %313 }
  0x8e   :  { %693 = vperm.xlu1 %1953, %v89_v63  }
  0x8f   :  { %1092 = vperm.xlu0 %1951, %v114_v0  }
  0x90   :  { %v2247_v7 = vpop.permute.xlu1 %337 }
  0x91   :  { %v2253_v10 = vpop.permute.xlu0 %309  ;;  %v415_v52 = vmul.f32 %v2268_v24, %v2247_v7  ;;  %v416_v11 = vmul.f32 %v2270_v25, %v2247_v7  ;;  %v417_v21 = vmul.f32 %v2272_v26, %v2247_v7 }
  0x92   :  { %683 = vperm.xlu1 %1953, %v87_v3  }
  0x93   :  { %1521 = vperm.xlu0 %1951, %v130_v8  }
  0x95   :  { %v548_v19 = vpop.permute.xlu1 %547  ;;  %v2263_v20 = vpop.permute.xlu0 %297 }
  0x96   :  { %673 = vperm.xlu1 %1953, %v85_v14   ;;  %v598_v5 = vadd.f32 %v548_v19, %v470_v58  ;;  %v599_v6 = vadd.f32 %v548_v19, %v471_v59  ;;  %v125_v14 = vld [vmem:[%s2986_s6 + $0x60] sm:$0xff]  ;;  %v597_v22 = vadd.f32 %v548_v19, %v469_v55 }
  0x98   :  { %v646_v36 = vmax.f32 %v598_v5, 0.0 }
  0x99   :  { %v2276_v28 = vpop.permute.xlu0 %293 }
  0x9a   :  { %v334_v31 = vpop.permute.xlu1 %333  ;;  %663 = vperm.xlu1 %1953, %v83_v23  }
  0x9b   :  { %v414_v40 = vmul.f32 %v2272_v26, %v334_v31 }
  0x9e   :  { %v210_v44 = vpop.permute.xlu0 %209  ;;  %653 = vperm.xlu1 %1953, %v81_v32  }
  0x9f   :  { %v285_v48 = vmul.f32 %v2274_v27, %v210_v44  ;;  %v286_v47 = vmul.f32 %v2278_v29, %v210_v44  ;;  %v287_v50 = vmul.f32 %v2280_v30, %v210_v44  ;;  %v2309_v53 = vpop.permute.xlu1 %184 }
  0xa1   :  { %v473_v63 = vadd.f32 %v425_v38, %v286_v47  ;;  %v474_v0 = vadd.f32 %v426_v39, %v287_v50  ;;  %v472_v3 = vadd.f32 %v424_v37, %v285_v48  ;;  %v647_v37 = vmax.f32 %v599_v6, 0.0 }
  0xa2   :  { %v195_v8 = vpop.permute.xlu0 %194  ;;  %1157 = vperm.xlu1 %1953, %v127_v46   ;;  %v412_v38 = vmul.f32 %v2268_v24, %v334_v31  ;;  %v413_v39 = vmul.f32 %v2270_v25, %v334_v31  ;;  %v645_v48 = vmax.f32 %v597_v22, 0.0  ;;  %v467_v47 = vadd.f32 %v419_v45, %v280_v60  ;;  %v123_v31 = vld [vmem:[%s2986_s6 + $0x50] sm:$0xff] }
  0xa3   :  { %v277_v12 = vmul.f32 %v2278_v29, %v195_v8  ;;  %v538_v13 = vpop.permute.xlu1 %537  ;;  %v601_v57 = vadd.f32 %v2229_v62, %v473_v63  ;;  %v276_v15 = vmul.f32 %v2274_v27, %v195_v8  ;;  %v278_v16 = vmul.f32 %v2280_v30, %v195_v8 }
  0xa4   :  { %v602_v17 = vadd.f32 %v2229_v62, %v474_v0  ;;  %v600_v18 = vadd.f32 %v2229_v62, %v472_v3  ;;  %v468_v50 = vadd.f32 %v420_v54, %v281_v4  ;;  %v121_v54 = vld [vmem:[%s2986_s6 + $0x40] sm:$0xff] }
  0xa5   :  { %v464_v23 = vadd.f32 %v416_v11, %v277_v12  ;;  %v649_v32 = vmax.f32 %v601_v57, 0.0  ;;  %v463_v7 = vadd.f32 %v415_v52, %v276_v15  ;;  %v465_v19 = vadd.f32 %v417_v21, %v278_v16 }
  0xa6   :  { %v190_v33 = vpop.permute.xlu0 %189  ;;  %1147 = vperm.xlu1 %1953, %v125_v14   ;;  %v650_v34 = vmax.f32 %v602_v17, 0.0  ;;  %v648_v35 = vmax.f32 %v600_v18, 0.0  ;;  %v409_v11 = vmul.f32 %v2268_v24, %v2217_v56  ;;  %v411_v12 = vmul.f32 %v2272_v26, %v2217_v56 }
  0xa7   :  { %v273_v62 = vmul.f32 %v2274_v27, %v190_v33  ;;  %v180_v41 = vpop.permute.xlu1 %179  ;;  %731 = vmatprep.subr.mxu0 %v649_v32  ;;  %v274_v42 = vmul.f32 %v2278_v29, %v190_v33  ;;  %v275_v43 = vmul.f32 %v2280_v30, %v190_v33  ;;  %v592_v44 = vadd.f32 %v538_v13, %v464_v23 }
  0xa8   :  { %1782 = vmatprep.subr.mxu1 %v650_v34  ;;  %732 = vmatpush1.msra.mxu0 %v648_v35  ;;  %v591_v6 = vadd.f32 %v538_v13, %v463_v7  ;;  %v593_v8 = vadd.f32 %v538_v13, %v465_v19  ;;  %v407_v57 = vmul.f32 %v2270_v25, %v2227_v61  ;;  %v119_v35 = vld [vmem:[%s2986_s6 + $0x30] sm:$0xff] }
  0xa9   :  { %1783 = vmatpush3.msra.mxu1 %v650_v34  ;;  %733 = vmatprep.subr.mxu0 %v646_v36  ;;  %v460_v55 = vadd.f32 %v412_v38, %v273_v62  ;;  %v461_v58 = vadd.f32 %v413_v39, %v274_v42  ;;  %v462_v59 = vadd.f32 %v414_v40, %v275_v43  ;;  %v640_v17 = vmax.f32 %v592_v44, 0.0 }
  0xaa   :  { %1784 = vmatprep.subr.mxu1 %v647_v37  ;;  %v543_v46 = vpop.permute.xlu0 %542  ;;  %734 = vmatpush1.msra.mxu0 %v645_v48  ;;  %v270_v15 = vmul.f32 %v2274_v27, %v2309_v53  ;;  %v271_v18 = vmul.f32 %v2278_v29, %v2309_v53  ;;  %v272_v21 = vmul.f32 %v2280_v30, %v2309_v53  ;;  %v641_v22 = vmax.f32 %v593_v8, 0.0 }
  0xab   :  { %1785 = vmatpush3.msra.mxu1 %v647_v37  ;;  %v594_v63 = vadd.f32 %v543_v46, %v466_v9  ;;  %v595_v0 = vadd.f32 %v543_v46, %v467_v47  ;;  %v596_v3 = vadd.f32 %v543_v46, %v468_v50  ;;  %v533_v5 = vpop.permute.xlu1 %532  ;;  %1137 = vperm.xlu1 %1953, %v123_v31   ;;  %v639_v23 = vmax.f32 %v591_v6, 0.0 }
  0xac   :  { %v589_v45 = vadd.f32 %v533_v5, %v461_v58  ;;  %v410_v9 = vmul.f32 %v2270_v25, %v2217_v56  ;;  %v590_v14 = vadd.f32 %v533_v5, %v462_v59  ;;  %v588_v16 = vadd.f32 %v533_v5, %v460_v55 }
  0xad   :  { %v643_v60 = vmax.f32 %v595_v0, 0.0  ;;  %v644_v4 = vmax.f32 %v596_v3, 0.0  ;;  %v642_v52 = vmax.f32 %v594_v63, 0.0  ;;  %v408_v32 = vmul.f32 %v2272_v26, %v2227_v61  ;;  %v115_v3 = vld [vmem:[%s2986_s6 + $0x10] sm:$0xff] }
  0xae   :  { %v2353_v13 = vpop.permute.xlu0 %174  ;;  %v268_v33 = vmul.f32 %v2278_v29, %v180_v41  ;;  %v269_v34 = vmul.f32 %v2280_v30, %v180_v41  ;;  %v637_v36 = vmax.f32 %v589_v45, 0.0  ;;  %v406_v53 = vmul.f32 %v2268_v24, %v2227_v61  ;;  %v117_v61 = vld [vmem:[%s2986_s6 + $0x20] sm:$0xff] }
  0xaf   :  { %735 = vmatprep.subr.mxu0 %v643_v60  ;;  %1786 = vmatprep.subr.mxu1 %v644_v4  ;;  %v267_v37 = vmul.f32 %v2274_v27, %v180_v41  ;;  %v638_v39 = vmax.f32 %v590_v14, 0.0  ;;  %v636_v40 = vmax.f32 %v588_v16, 0.0  ;;  %v457_v62 = vadd.f32 %v409_v11, %v270_v15 }
  0xb0   :  { %1127 = vperm.xlu1 %1953, %v121_v54   ;;  %v322_v56 = vpop.permute.xlu1 %321  ;;  %736 = vmatpush1.msra.mxu0 %v642_v52  ;;  %v458_v7 = vadd.f32 %v410_v9, %v271_v18  ;;  %v459_v19 = vadd.f32 %v411_v12, %v272_v21  ;;  %v455_v43 = vadd.f32 %v407_v57, %v268_v33  ;;  %v113_v52 = vld [vmem:[%s2986_s6] sm:$0xff] }
  0xb1   :  { %1787 = vmatpush3.msra.mxu1 %v644_v4  ;;  %737 = vmatprep.subr.mxu0 %v640_v17  ;;  %v456_v44 = vadd.f32 %v408_v32, %v269_v34  ;;  %v454_v50 = vadd.f32 %v406_v53, %v267_v37  ;;  %v264_v54 = vmul.f32 %v2274_v27, %v2353_v13 }
  0xb2   :  { %1788 = vmatprep.subr.mxu1 %v641_v22  ;;  %738 = vmatpush1.msra.mxu0 %v639_v23  ;;  %v170_v38 = vpop.permute.xlu0 %169  ;;  %v265_v60 = vmul.f32 %v2278_v29, %v2353_v13  ;;  %v266_v4 = vmul.f32 %v2280_v30, %v2353_v13  ;;  %v403_v11 = vmul.f32 %v2268_v24, %v322_v56 }
  0xb3   :  { %1789 = vmatpush3.msra.mxu1 %v641_v22  ;;  %739 = vmatprep.subr.mxu0 %v637_v36  ;;  %v404_v9 = vmul.f32 %v2270_v25, %v322_v56  ;;  %v405_v12 = vmul.f32 %v2272_v26, %v322_v56  ;;  %v261_v17 = vmul.f32 %v2274_v27, %v170_v38 }
  0xb4   :  { %1117 = vperm.xlu1 %1953, %v119_v35   ;;  %1790 = vmatprep.subr.mxu1 %v638_v39  ;;  %v451_v57 = vadd.f32 %v403_v11, %v264_v54  ;;  %v262_v23 = vmul.f32 %v2278_v29, %v170_v38  ;;  %v263_v32 = vmul.f32 %v2280_v30, %v170_v38 }
  0xb5   :  { %740 = vmatpush1.msra.mxu0 %v636_v40  ;;  %1791 = vmatpush3.msra.mxu1 %v638_v39  ;;  %v528_v42 = vpop.permute.xlu1 %527  ;;  %v452_v15 = vadd.f32 %v404_v9, %v265_v60  ;;  %v453_v16 = vadd.f32 %v405_v12, %v266_v4 }
  0xb6   :  { %v585_v41 = vadd.f32 %v528_v42, %v457_v62  ;;  %v586_v48 = vadd.f32 %v528_v42, %v458_v7  ;;  %v587_v47 = vadd.f32 %v528_v42, %v459_v19  ;;  %v523_v31 = vpop.permute.xlu0 %522 }
  0xb7   :  { %v583_v46 = vadd.f32 %v523_v31, %v455_v43  ;;  %v584_v55 = vadd.f32 %v523_v31, %v456_v44  ;;  %v582_v58 = vadd.f32 %v523_v31, %v454_v50  ;;  %v395_v31 = vmul.f32 %v2270_v25, %v2253_v10 }
  0xb8   :  { %1107 = vperm.xlu1 %1953, %v117_v61   ;;  %v634_v59 = vmax.f32 %v586_v48, 0.0  ;;  %v635_v63 = vmax.f32 %v587_v47, 0.0  ;;  %v633_v0 = vmax.f32 %v585_v41, 0.0 }
  0xb9   :  { %v631_v5 = vmax.f32 %v583_v46, 0.0  ;;  %v632_v6 = vmax.f32 %v584_v55, 0.0  ;;  %v630_v45 = vmax.f32 %v582_v58, 0.0  ;;  %v396_v46 = vmul.f32 %v2272_v26, %v2253_v10 }
  0xba   :  { %v318_v8 = vpop.permute.xlu1 %317  ;;  %741 = vmatprep.subr.mxu0 %v634_v59  ;;  %1792 = vmatprep.subr.mxu1 %v635_v63  ;;  %v2397_v39 = vpop.permute.xlu0 %154 }
  0xbb   :  { %742 = vmatpush1.msra.mxu0 %v633_v0  ;;  %1793 = vmatpush3.msra.mxu1 %v635_v63  ;;  %v400_v33 = vmul.f32 %v2268_v24, %v318_v8  ;;  %v401_v56 = vmul.f32 %v2270_v25, %v318_v8  ;;  %v402_v34 = vmul.f32 %v2272_v26, %v318_v8 }
  0xbc   :  { %1097 = vperm.xlu1 %1953, %v115_v3   ;;  %743 = vmatprep.subr.mxu0 %v631_v5  ;;  %v394_v3 = vmul.f32 %v2268_v24, %v2253_v10  ;;  %v398_v8 = vmul.f32 %v2270_v25, %v2239_v2 }
  0xbd   :  { %1794 = vmatprep.subr.mxu1 %v632_v6  ;;  %744 = vmatpush1.msra.mxu0 %v630_v45  ;;  %v448_v40 = vadd.f32 %v400_v33, %v261_v17  ;;  %v449_v62 = vadd.f32 %v401_v56, %v262_v23  ;;  %v450_v7 = vadd.f32 %v402_v34, %v263_v32 }
  0xbe   :  { %1795 = vmatpush3.msra.mxu1 %v632_v6  ;;  %v2400_v61 = vpop.permute.xlu0 %149  ;;  %v397_v6 = vmul.f32 %v2268_v24, %v2239_v2  ;;  %v399_v45 = vmul.f32 %v2272_v26, %v2239_v2 }
  0xbf   :  { %v165_v14 = vpop.permute.xlu1 %164 }
  0xc0   :  { %1087 = vperm.xlu1 %1953, %v113_v52   ;;  %v258_v58 = vmul.f32 %v2274_v27, %v165_v14  ;;  %v259_v59 = vmul.f32 %v2278_v29, %v165_v14  ;;  %v260_v63 = vmul.f32 %v2280_v30, %v165_v14 }
  0xc2   :  { %v503_v4 = vpop.permute.xlu0 %502  ;;  %v445_v52 = vadd.f32 %v397_v6, %v258_v58  ;;  %v446_v11 = vadd.f32 %v398_v8, %v259_v59  ;;  %v447_v9 = vadd.f32 %v399_v45, %v260_v63  ;;  %v251_v58 = vmul.f32 %v2280_v30, %v2400_v61 }
  0xc3   :  { %v518_v13 = vpop.permute.xlu1 %517 }
  0xc4   :  { %v579_v18 = vadd.f32 %v518_v13, %v451_v57  ;;  %v580_v21 = vadd.f32 %v518_v13, %v452_v15  ;;  %v581_v22 = vadd.f32 %v518_v13, %v453_v16 }
  0xc6   :  { %v628_v35 = vmax.f32 %v580_v21, 0.0  ;;  %v629_v36 = vmax.f32 %v581_v22, 0.0  ;;  %v627_v53 = vmax.f32 %v579_v18, 0.0 }
  0xc7   :  { %v160_v37 = vpop.permute.xlu1 %159 }
  0xc8   :  { %745 = vmatprep.subr.mxu0 %v628_v35  ;;  %1796 = vmatprep.subr.mxu1 %v629_v36  ;;  %v256_v44 = vmul.f32 %v2278_v29, %v160_v37  ;;  %v257_v41 = vmul.f32 %v2280_v30, %v160_v37  ;;  %v255_v55 = vmul.f32 %v2274_v27, %v160_v37 }
  0xc9   :  { %746 = vmatpush1.msra.mxu0 %v627_v53  ;;  %1797 = vmatpush3.msra.mxu1 %v629_v36  ;;  %v252_v36 = vmul.f32 %v2274_v27, %v2397_v39  ;;  %v253_v53 = vmul.f32 %v2278_v29, %v2397_v39  ;;  %v254_v37 = vmul.f32 %v2280_v30, %v2397_v39 }
  0xca   :  { %v443_v5 = vadd.f32 %v395_v31, %v256_v44  ;;  %v444_v54 = vadd.f32 %v396_v46, %v257_v41  ;;  %v442_v60 = vadd.f32 %v394_v3, %v255_v55  ;;  %v249_v39 = vmul.f32 %v2274_v27, %v2400_v61 }
  0xcb   :  { %v513_v38 = vpop.permute.xlu1 %512  ;;  %v250_v55 = vmul.f32 %v2278_v29, %v2400_v61  ;;  %v383_v61 = vmul.f32 %v2270_v25, %v2276_v28 }
  0xcc   :  { %v576_v19 = vadd.f32 %v513_v38, %v448_v40  ;;  %v577_v42 = vadd.f32 %v513_v38, %v449_v62  ;;  %v578_v43 = vadd.f32 %v513_v38, %v450_v7  ;;  %v571_v10 = vadd.f32 %v503_v4, %v443_v5 }
  0xcd   :  { %v572_v16 = vadd.f32 %v503_v4, %v444_v54  ;;  %v570_v13 = vadd.f32 %v503_v4, %v442_v60  ;;  %v135_v54 = vpop.permute.xlu0 %134 }
  0xce   :  { %v625_v48 = vmax.f32 %v577_v42, 0.0  ;;  %v626_v47 = vmax.f32 %v578_v43, 0.0  ;;  %v624_v50 = vmax.f32 %v576_v19, 0.0  ;;  %v619_v2 = vmax.f32 %v571_v10, 0.0 }
  0xcf   :  { %v620_v23 = vmax.f32 %v572_v16, 0.0  ;;  %v618_v32 = vmax.f32 %v570_v13, 0.0  ;;  %v382_v16 = vmul.f32 %v2268_v24, %v2276_v28 }
  0xd0   :  { %v306_v0 = vpop.permute.xlu1 %305  ;;  %747 = vmatprep.subr.mxu0 %v625_v48  ;;  %1798 = vmatprep.subr.mxu1 %v626_v47 }
  0xd1   :  { %748 = vmatpush1.msra.mxu0 %v624_v50  ;;  %1799 = vmatpush3.msra.mxu1 %v626_v47  ;;  %v391_v33 = vmul.f32 %v2268_v24, %v306_v0  ;;  %v392_v56 = vmul.f32 %v2270_v25, %v306_v0  ;;  %v393_v34 = vmul.f32 %v2272_v26, %v306_v0 }
  0xd3   :  { %v439_v40 = vadd.f32 %v391_v33, %v252_v36  ;;  %v440_v62 = vadd.f32 %v392_v56, %v253_v53  ;;  %v441_v7 = vadd.f32 %v393_v34, %v254_v37  ;;  %v483_v33 = vpop.permute.xlu0 %482  ;;  %v240_v36 = vmul.f32 %v2274_v27, %v135_v54 }
  0xd4   :  { %v241_v53 = vmul.f32 %v2278_v29, %v135_v54  ;;  %v242_v37 = vmul.f32 %v2280_v30, %v135_v54  ;;  %v76_v54 = vld [vmem:[%s2983_s3 + $0x58] sm:$0xff] }
  0xd5   :  { %v508_v12 = vpop.permute.xlu1 %507 }
  0xd6   :  { %v573_v14 = vadd.f32 %v508_v12, %v445_v52  ;;  %v574_v57 = vadd.f32 %v508_v12, %v446_v11  ;;  %v575_v15 = vadd.f32 %v508_v12, %v447_v9  ;;  %v384_v9 = vmul.f32 %v2272_v26, %v2276_v28 }
  0xd8   :  { %v622_v17 = vmax.f32 %v574_v57, 0.0  ;;  %v623_v18 = vmax.f32 %v575_v15, 0.0  ;;  %v621_v21 = vmax.f32 %v573_v14, 0.0 }
  0xda   :  { %v302_v22 = vpop.permute.xlu1 %301  ;;  %749 = vmatprep.subr.mxu0 %v622_v17  ;;  %1800 = vmatprep.subr.mxu1 %v623_v18  ;;  %v385_v17 = vmul.f32 %v2268_v24, %v2263_v20 }
  0xdb   :  { %750 = vmatpush1.msra.mxu0 %v621_v21  ;;  %1801 = vmatpush3.msra.mxu1 %v623_v18  ;;  %v388_v44 = vmul.f32 %v2268_v24, %v302_v22  ;;  %v389_v41 = vmul.f32 %v2270_v25, %v302_v22  ;;  %v390_v48 = vmul.f32 %v2272_v26, %v302_v22 }
  0xdc   :  { %751 = vmatprep.subr.mxu0 %v619_v2  ;;  %1802 = vmatprep.subr.mxu1 %v620_v23  ;;  %v386_v18 = vmul.f32 %v2270_v25, %v2263_v20  ;;  %v387_v21 = vmul.f32 %v2272_v26, %v2263_v20 }
  0xdd   :  { %752 = vmatpush1.msra.mxu0 %v618_v32  ;;  %1803 = vmatpush3.msra.mxu1 %v620_v23  ;;  %v436_v59 = vadd.f32 %v388_v44, %v249_v39  ;;  %v437_v63 = vadd.f32 %v389_v41, %v250_v55  ;;  %v438_v0 = vadd.f32 %v390_v48, %v251_v58  ;;  %v66_v58 = vld [vmem:[%s2983_s3 + $0x8] sm:$0xff] }
  0xdf   :  { %v145_v35 = vpop.permute.xlu1 %144 }
  0xe0   :  { %v246_v10 = vmul.f32 %v2274_v27, %v145_v35  ;;  %v247_v14 = vmul.f32 %v2278_v29, %v145_v35  ;;  %v248_v57 = vmul.f32 %v2280_v30, %v145_v35 }
  0xe2   :  { %v433_v56 = vadd.f32 %v385_v17, %v246_v10  ;;  %v434_v34 = vadd.f32 %v386_v18, %v247_v14  ;;  %v435_v35 = vadd.f32 %v387_v21, %v248_v57 }
  0xe3   :  { %v498_v38 = vpop.permute.xlu1 %497 }
  0xe4   :  { %v567_v19 = vadd.f32 %v498_v38, %v439_v40  ;;  %v568_v42 = vadd.f32 %v498_v38, %v440_v62  ;;  %v569_v43 = vadd.f32 %v498_v38, %v441_v7 }
  0xe6   :  { %v616_v47 = vmax.f32 %v568_v42, 0.0  ;;  %v617_v50 = vmax.f32 %v569_v43, 0.0  ;;  %v615_v31 = vmax.f32 %v567_v19, 0.0 }
  0xe7   :  { %v140_v46 = vpop.permute.xlu1 %139 }
  0xe8   :  { %753 = vmatprep.subr.mxu0 %v616_v47  ;;  %1804 = vmatprep.subr.mxu1 %v617_v50  ;;  %v244_v45 = vmul.f32 %v2278_v29, %v140_v46  ;;  %v245_v60 = vmul.f32 %v2280_v30, %v140_v46  ;;  %v243_v12 = vmul.f32 %v2274_v27, %v140_v46 }
  0xe9   :  { %754 = vmatpush1.msra.mxu0 %v615_v31  ;;  %1805 = vmatpush3.msra.mxu1 %v617_v50 }
  0xea   :  { %v431_v13 = vadd.f32 %v383_v61, %v244_v45  ;;  %v432_v22 = vadd.f32 %v384_v9, %v245_v60  ;;  %v430_v2 = vadd.f32 %v382_v16, %v243_v12  ;;  %v75_v45 = vld [vmem:[%s2983_s3 + $0x50] sm:$0xff]  ;;  %v77_v60 = vld [vmem:[%s2983_s3 + $0x60] sm:$0xff] }
  0xeb   :  { %v493_v3 = vpop.permute.xlu1 %492  ;;  %v2526_v61 = vld [vmem:[%s2985_s5] sm:$0xff] }
  0xec   :  { %v564_v5 = vadd.f32 %v493_v3, %v436_v59  ;;  %v565_v6 = vadd.f32 %v493_v3, %v437_v63  ;;  %v566_v8 = vadd.f32 %v493_v3, %v438_v0  ;;  %v559_v20 = vadd.f32 %v483_v33, %v431_v13  ;;  %v67_v59 = vld [vmem:[%s2983_s3 + $0x10] sm:$0xff]  ;;  %v68_v63 = vld [vmem:[%s2983_s3 + $0x18] sm:$0xff]  ;;  %v69_v0 = vld [vmem:[%s2983_s3 + $0x20] sm:$0xff] }
  0xed   :  { %v558_v42 = vadd.f32 %v483_v33, %v430_v2  ;;  %v71_v3 = vld [vmem:[%s2983_s3 + $0x30] sm:$0xff]  ;;  %v2553_v2 = vpop.permute.xlu0 %728 }
  0xee   :  { %v613_v4 = vmax.f32 %v565_v6, 0.0  ;;  %v614_v52 = vmax.f32 %v566_v8, 0.0  ;;  %v612_v11 = vmax.f32 %v564_v5, 0.0  ;;  %v607_v47 = vmax.f32 %v559_v20, 0.0  ;;  %v72_v5 = vld [vmem:[%s2983_s3 + $0x38] sm:$0xff]  ;;  %v73_v6 = vld [vmem:[%s2983_s3 + $0x40] sm:$0xff] }
  0xef   :  { %v606_v31 = vmax.f32 %v558_v42, 0.0  ;;  %v74_v8 = vld [vmem:[%s2983_s3 + $0x48] sm:$0xff] }
  0xf0   :  { %755 = vmatprep.subr.mxu0 %v613_v4  ;;  %1806 = vmatprep.subr.mxu1 %v614_v52  ;;  %v290_v15 = vpop.permute.xlu1 %289  ;;  %v78_v4 = vld [vmem:[%s2983_s3 + $0x68] sm:$0xff] }
  0xf1   :  { %756 = vmatpush1.msra.mxu0 %v612_v11  ;;  %1807 = vmatpush3.msra.mxu1 %v614_v52  ;;  %v379_v23 = vmul.f32 %v2268_v24, %v290_v15  ;;  %v380_v32 = vmul.f32 %v2270_v25, %v290_v15  ;;  %v381_v28 = vmul.f32 %v2272_v26, %v290_v15  ;;  %v79_v52 = vld [vmem:[%s2983_s3 + $0x70] sm:$0xff]  ;;  %v80_v11 = vld [vmem:[%s2983_s3 + $0x78] sm:$0xff] }
  0xf2   :  { %v560_v24 = vadd.f32 %v483_v33, %v432_v22 }
  0xf3   :  { %v427_v19 = vadd.f32 %v379_v23, %v240_v36  ;;  %v428_v25 = vadd.f32 %v380_v32, %v241_v53  ;;  %v429_v43 = vadd.f32 %v381_v28, %v242_v37  ;;  %v2563_v36 = vpop.permute.xlu0 %718 }
  0xf4   :  { %v608_v30 = vmax.f32 %v560_v24, 0.0 }
  0xf5   :  { %v488_v40 = vpop.permute.xlu1 %487 }
  0xf6   :  { %v561_v62 = vadd.f32 %v488_v40, %v433_v56  ;;  %v562_v7 = vadd.f32 %v488_v40, %v434_v34  ;;  %v563_v38 = vadd.f32 %v488_v40, %v435_v35 }
  0xf7   :  { %v2573_v24 = vpop.permute.xlu0 %708 }
  0xf8   :  { %v610_v26 = vmax.f32 %v562_v7, 0.0  ;;  %v611_v44 = vmax.f32 %v563_v38, 0.0  ;;  %v609_v41 = vmax.f32 %v561_v62, 0.0 }
  0xf9   :  { %v478_v48 = vpop.permute.xlu1 %477 }
  0xfa   :  { %v555_v27 = vadd.f32 %v478_v48, %v427_v19  ;;  %v556_v50 = vadd.f32 %v478_v48, %v428_v25  ;;  %v557_v29 = vadd.f32 %v478_v48, %v429_v43  ;;  %757 = vmatprep.subr.mxu0 %v610_v26  ;;  %1808 = vmatprep.subr.mxu1 %v611_v44 }
  0xfb   :  { %758 = vmatpush1.msra.mxu0 %v609_v41  ;;  %1809 = vmatpush3.msra.mxu1 %v611_v44  ;;  %v2583_v48 = vpop.permute.xlu0 %698 }
  0xfc   :  { %759 = vmatprep.subr.mxu0 %v607_v47  ;;  %1810 = vmatprep.subr.mxu1 %v608_v30  ;;  %v604_v46 = vmax.f32 %v556_v50, 0.0  ;;  %v605_v39 = vmax.f32 %v557_v29, 0.0  ;;  %v603_v55 = vmax.f32 %v555_v27, 0.0 }
  0xfd   :  { %760 = vmatpush1.msra.mxu0 %v606_v31  ;;  %1811 = vmatpush3.msra.mxu1 %v608_v30  ;;  %v2557_v33 = vpop.permute.xlu1 %723 }
  0xfe   :  { %761 = vmatprep.subr.mxu0 %v604_v46  ;;  %1812 = vmatprep.subr.mxu1 %v605_v39 }
  0xff   :  { %762 = vmatpush1.msra.mxu0 %v603_v55  ;;  %1813 = vmatpush3.msra.mxu1 %v605_v39 }
 0x100   :  { %796 = vmatmul.mubr.f32.vlgmr.msra.gmra.mxu0 %v2202_v49  ;;  %1815 = vmatmul.mubr.f32.vlgmr.msra.gmra.mxu1 %v66_v58  ;;  %v70_v49 = vld [vmem:[%s2983_s3 + $0x28] sm:$0xff] }
 0x101   :  { %801 = vmatprep.mubr.f32.mxu0 %v1979_v51  ;;  %1817 = vmatprep.mubr.f32.mxu1 %v67_v59  ;;  %v2567_v40 = vpop.permute.xlu1 %713 }
 0x104   :  { %802 = vmatmul.mubr.f32.gmra.mxu0 %v66_v58  ;;  %1818 = vmatmul.mubr.f32.gmra.mxu1 %v68_v63 }
 0x105   :  { %807 = vmatprep.mubr.f32.mxu0 %v1979_v51  ;;  %1820 = vmatprep.mubr.f32.mxu1 %v69_v0  ;;  %v2577_v42 = vpop.permute.xlu1 %703 }
 0x108   :  { %808 = vmatmul.mubr.f32.gmra.mxu0 %v67_v59  ;;  %1821 = vmatmul.mubr.f32.gmra.mxu1 %v70_v49 }
 0x109   :  { %813 = vmatprep.mubr.f32.mxu0 %v1979_v51  ;;  %1823 = vmatprep.mubr.f32.mxu1 %v71_v3  ;;  %v2590_v46 = vpop.permute.xlu1 %693 }
 0x10c   :  { %814 = vmatmul.mubr.f32.gmra.mxu0 %v68_v63  ;;  %1824 = vmatmul.mubr.f32.gmra.mxu1 %v72_v5 }
 0x10d   :  { %819 = vmatprep.mubr.f32.mxu0 %v1979_v51  ;;  %1826 = vmatprep.mubr.f32.mxu1 %v73_v6 }
 0x110   :  { %820 = vmatmul.mubr.f32.gmra.mxu0 %v69_v0  ;;  %1827 = vmatmul.mubr.f32.gmra.mxu1 %v74_v8 }
 0x111   :  { %825 = vmatprep.mubr.f32.mxu0 %v1979_v51  ;;  %1829 = vmatprep.mubr.f32.mxu1 %v75_v45 }
 0x114   :  { %826 = vmatmul.mubr.f32.gmra.mxu0 %v70_v49  ;;  %1830 = vmatmul.mubr.f32.gmra.mxu1 %v76_v54  ;;  %v2598_v49 = vpop.permute.xlu0 %688 }
 0x115   :  { %831 = vmatprep.mubr.f32.mxu0 %v1979_v51  ;;  %1832 = vmatprep.mubr.f32.mxu1 %v77_v60 }
 0x118   :  { %832 = vmatmul.mubr.f32.gmra.mxu0 %v71_v3  ;;  %1833 = vmatmul.mubr.f32.gmra.mxu1 %v78_v4 }
 0x119   :  { %837 = vmatprep.mubr.f32.mxu0 %v1979_v51  ;;  %1835 = vmatprep.mubr.f32.mxu1 %v79_v52 }
 0x11c   :  { %838 = vmatmul.mubr.f32.gmra.mxu0 %v72_v5  ;;  %1836 = vmatmul.mubr.f32.gmra.mxu1 %v80_v11 }
 0x11d   :  { %843 = vmatprep.mubr.f32.mxu0 %v1979_v51  ;;  %1229 = vmatprep.mubr.f32.mxu1 %v1979_v51 }
 0x120   :  { %844 = vmatmul.mubr.f32.gmra.mxu0 %v73_v6 }
 0x121   :  { %849 = vmatprep.mubr.f32.mxu0 %v1979_v51 }
 0x124   :  { %850 = vmatmul.mubr.f32.gmra.mxu0 %v74_v8  ;;  %v2603_v8 = vpop.permute.xlu1 %683 }
 0x125   :  { %855 = vmatprep.mubr.f32.mxu0 %v1979_v51 }
 0x128   :  { %856 = vmatmul.mubr.f32.gmra.mxu0 %v75_v45 }
 0x129   :  { %861 = vmatprep.mubr.f32.mxu0 %v1979_v51 }
 0x12c   :  { %862 = vmatmul.mubr.f32.gmra.mxu0 %v76_v54 }
 0x12d   :  { %867 = vmatprep.mubr.f32.mxu0 %v1979_v51 }
 0x130   :  { %868 = vmatmul.mubr.f32.gmra.mxu0 %v77_v60 }
 0x131   :  { %873 = vmatprep.mubr.f32.mxu0 %v1979_v51 }
 0x134   :  { %874 = vmatmul.mubr.f32.gmra.mxu0 %v78_v4 }
 0x135   :  { %879 = vmatprep.mubr.f32.mxu0 %v1979_v51 }
 0x138   :  { %880 = vmatmul.mubr.f32.gmra.mxu0 %v79_v52 }
 0x139   :  { %885 = vmatprep.mubr.f32.mxu0 %v1979_v51 }
 0x13c   :  { %886 = vmatmul.mubr.f32.gmra.mxu0 %v80_v11 }
 0x13d   :  { %1870 = vmatprep.mubr.f32.mxu0 %v2526_v61 }
 0x1c0   :  { %v2529_v9 = vpop.f32.mrf.mxu0  ;;  %v2531_v12 = vpop.f32.mrf.mxu1 }
 0x1c2   :  { %v2533_v10 = vpop.f32.mrf.mxu0  ;;  %v2535_v14 = vpop.f32.mrf.mxu1 }
 0x1c4   :  { %v2537_v57 = vpop.f32.mrf.mxu0  ;;  %v2539_v15 = vpop.f32.mrf.mxu1 }
 0x1c6   :  { %v2541_v16 = vpop.f32.mrf.mxu0  ;;  %v2543_v13 = vpop.f32.mrf.mxu1 }
 0x1c8   :  { %v2545_v17 = vpop.f32.mrf.mxu0  ;;  %v2547_v18 = vpop.f32.mrf.mxu1 }
 0x1ca   :  { %v2549_v21 = vpop.f32.mrf.mxu0  ;;  %v2551_v22 = vpop.f32.mrf.mxu1 }
 0x1cc   :  { %v2555_v23 = vpop.f32.mrf.mxu0  ;;  %v1825_v32 = vpop.f32.mrf.mxu1 }
 0x1ce   :  { %v2559_v28 = vpop.f32.mrf.mxu0  ;;  %v988_v56 = vpop.f32.mrf.mxu1 }
 0x1d0   :  { %v2561_v34 = vpop.f32.mrf.mxu0  ;;  %v1828_v35 = vpop.f32.mrf.mxu1 }
 0x1d1   :  { %v1004_v54 = vadd.f32 %v1828_v35, %v2583_v48 }
 0x1d2   :  { %v2565_v53 = vpop.f32.mrf.mxu0  ;;  %v998_v37 = vpop.f32.mrf.mxu1 }
 0x1d3   :  { %v999_v52 = vadd.f32 %v998_v37, %v2590_v46 }
 0x1d4   :  { %v2569_v20 = vpop.f32.mrf.mxu0  ;;  %v1831_v62 = vpop.f32.mrf.mxu1 }
 0x1d5   :  { %v1014_v63 = vadd.f32 %v1831_v62, %v2573_v24  ;;  %v2611_v62 = vpop.permute.xlu0 %678 }
 0x1d6   :  { %v2571_v7 = vpop.f32.mrf.mxu0  ;;  %v1008_v38 = vpop.f32.mrf.mxu1 }
 0x1d7   :  { %v1009_v5 = vadd.f32 %v1008_v38, %v2577_v42  ;;  %v1072_v60 = vmax.f32 %v1014_v63, 0.0 }
 0x1d8   :  { %v2575_v19 = vpop.f32.mrf.mxu0  ;;  %v1834_v25 = vpop.f32.mrf.mxu1 }
 0x1d9   :  { %v1024_v29 = vadd.f32 %v1834_v25, %v2563_v36  ;;  %v1069_v11 = vmax.f32 %v1009_v5, 0.0  ;;  %v994_v25 = vadd.f32 %v1825_v32, %v2598_v49  ;;  %v2625_v32 = vpop.permute.xlu0 %668 }
 0x1da   :  { %v2579_v43 = vpop.f32.mrf.mxu0  ;;  %v1018_v26 = vpop.f32.mrf.mxu1 }
 0x1db   :  { %v1019_v55 = vadd.f32 %v1018_v26, %v2567_v40  ;;  %v1078_v0 = vmax.f32 %v1024_v29, 0.0  ;;  %v1066_v26 = vmax.f32 %v1004_v54, 0.0  ;;  %v984_v29 = vadd.f32 %v2547_v18, %v2611_v62 }
 0x1dc   :  { %v2581_v44 = vpop.f32.mrf.mxu0  ;;  %v1837_v41 = vpop.f32.mrf.mxu1 }
 0x1dd   :  { %v1034_v47 = vadd.f32 %v1837_v41, %v2553_v2  ;;  %v1075_v6 = vmax.f32 %v1019_v55, 0.0  ;;  %v2616_v41 = vpop.permute.xlu1 %673  ;;  %v1054_v5 = vmax.f32 %v984_v29, 0.0 }
 0x1de   :  { %v2586_v27 = vpop.f32.mrf.mxu0  ;;  %v1028_v50 = vpop.f32.mrf.mxu1  ;;  %v979_v55 = vadd.f32 %v2551_v22, %v2616_v41 }
 0x1df   :  { %v1084_v30 = vmax.f32 %v1034_v47, 0.0  ;;  %v1029_v31 = vadd.f32 %v1028_v50, %v2557_v33  ;;  %v989_v47 = vadd.f32 %v988_v56, %v2603_v8  ;;  %v1063_v50 = vmax.f32 %v999_v52, 0.0 }
 0x1e0   :  { %v2592_v39 = vpop.f32.mrf.mxu0  ;;  %v1051_v54 = vmax.f32 %v979_v55, 0.0 }
 0x1e1   :  { %v1081_v58 = vmax.f32 %v1029_v31, 0.0  ;;  %1838 = vmatprep.subr.mxu0 %v1084_v30  ;;  %v2629_v56 = vpop.permute.xlu1 %663 }
 0x1e2   :  { %v2595_v59 = vpop.f32.mrf.mxu0  ;;  %1839 = vmatpush3.msra.mxu0 %v1084_v30  ;;  %v1060_v30 = vmax.f32 %v994_v25, 0.0 }
 0x1e3   :  { %1840 = vmatprep.subr.mxu0 %v1081_v58 }
 0x1e4   :  { %v2600_v3 = vpop.f32.mrf.mxu0  ;;  %1841 = vmatpush3.msra.mxu0 %v1081_v58  ;;  %v1057_v58 = vmax.f32 %v989_v47, 0.0 }
 0x1e5   :  { %1842 = vmatprep.subr.mxu0 %v1078_v0  ;;  %v2639_v25 = vpop.permute.xlu1 %653 }
 0x1e6   :  { %v2605_v45 = vpop.f32.mrf.mxu0  ;;  %1843 = vmatpush3.msra.mxu0 %v1078_v0  ;;  %v974_v0 = vadd.f32 %v2539_v15, %v2625_v32 }
 0x1e7   :  { %1844 = vmatprep.subr.mxu0 %v1075_v6 }
 0x1e8   :  { %v2608_v4 = vpop.f32.mrf.mxu0  ;;  %1845 = vmatpush3.msra.mxu0 %v1075_v6  ;;  %v969_v6 = vadd.f32 %v2543_v13, %v2629_v56 }
 0x1e9   :  { %1846 = vmatprep.subr.mxu0 %v1072_v60 }
 0x1ea   :  { %v2613_v38 = vpop.f32.mrf.mxu0  ;;  %1847 = vmatpush3.msra.mxu0 %v1072_v60  ;;  %v2635_v60 = vpop.permute.xlu0 %658  ;;  %v1045_v47 = vmax.f32 %v969_v6, 0.0 }
 0x1eb   :  { %1848 = vmatprep.subr.mxu0 %v1069_v11  ;;  %v964_v52 = vadd.f32 %v2531_v12, %v2635_v60 }
 0x1ec   :  { %v2618_v35 = vpop.f32.mrf.mxu0  ;;  %1849 = vmatpush3.msra.mxu0 %v1069_v11  ;;  %v1048_v11 = vmax.f32 %v974_v0, 0.0 }
 0x1ed   :  { %1850 = vmatprep.subr.mxu0 %v1066_v26 }
 0x1ee   :  { %v2621_v37 = vpop.f32.mrf.mxu0  ;;  %1851 = vmatpush3.msra.mxu0 %v1066_v26  ;;  %v959_v26 = vadd.f32 %v2535_v14, %v2639_v25 }
 0x1ef   :  { %1852 = vmatprep.subr.mxu0 %v1063_v50 }
 0x1f0   :  { %v869_v31 = vpop.f32.mrf.mxu0  ;;  %1853 = vmatpush3.msra.mxu0 %v1063_v50  ;;  %v1042_v50 = vmax.f32 %v964_v52, 0.0 }
 0x1f1   :  { %1854 = vmatprep.subr.mxu0 %v1060_v30 }
 0x1f2   :  { %v871_v63 = vpop.f32.mrf.mxu0  ;;  %1855 = vmatpush3.msra.mxu0 %v1060_v30  ;;  %v1039_v30 = vmax.f32 %v959_v26, 0.0 }
 0x1f3   :  { %1856 = vmatprep.subr.mxu0 %v1057_v58 }
 0x1f4   :  { %v875_v18 = vpop.f32.mrf.mxu0  ;;  %1857 = vmatpush3.msra.mxu0 %v1057_v58  ;;  %v2647_v58 = vld [vmem:[%s2985_s5 + $0x8] sm:$0xff] }
 0x1f5   :  { %1858 = vmatprep.subr.mxu0 %v1054_v5 }
 0x1f6   :  { %v877_v22 = vpop.f32.mrf.mxu0  ;;  %1859 = vmatpush3.msra.mxu0 %v1054_v5  ;;  %v2654_v5 = vld [vmem:[%s2985_s5 + $0x10] sm:$0xff] }
 0x1f7   :  { %1860 = vmatprep.subr.mxu0 %v1051_v54 }
 0x1f8   :  { %v881_v15 = vpop.f32.mrf.mxu0  ;;  %1861 = vmatpush3.msra.mxu0 %v1051_v54  ;;  %v878_v54 = vadd.f32 %v877_v22, %v2563_v36  ;;  %v870_v22 = vadd.f32 %v869_v31, %v2567_v40  ;;  %v860_v31 = vadd.f32 %v2613_v38, %v2577_v42  ;;  %v852_v38 = vadd.f32 %v2600_v3, %v2583_v48 }
 0x1f9   :  { %1862 = vmatprep.subr.mxu0 %v1048_v11  ;;  %v882_v6 = vadd.f32 %v881_v15, %v2557_v33 }
 0x1fa   :  { %v883_v13 = vpop.f32.mrf.mxu0  ;;  %1863 = vmatpush3.msra.mxu0 %v1048_v11  ;;  %v876_v11 = vadd.f32 %v875_v18, %v2563_v36  ;;  %v866_v18 = vadd.f32 %v2621_v37, %v2573_v24  ;;  %v1077_v15 = vmax.f32 %v878_v54, 0.0  ;;  %v1064_v54 = vmax.f32 %v852_v38, 0.0 }
 0x1fb   :  { %1864 = vmatprep.subr.mxu0 %v1045_v47  ;;  %v884_v14 = vadd.f32 %v883_v13, %v2557_v33  ;;  %v2670_v33 = vld [vmem:[%s2985_s5 + $0x20] sm:$0xff]  ;;  %v1079_v36 = vmax.f32 %v882_v6, 0.0 }
 0x1fc   :  { %v887_v29 = vpop.f32.mrf.mxu0  ;;  %1865 = vmatpush3.msra.mxu0 %v1045_v47  ;;  %v872_v47 = vadd.f32 %v871_v63, %v2567_v40  ;;  %v864_v63 = vadd.f32 %v2618_v35, %v2573_v24  ;;  %v2682_v40 = vld [vmem:[%s2985_s5 + $0x28] sm:$0xff]  ;;  %v858_v24 = vadd.f32 %v2608_v4, %v2577_v42  ;;  %v1073_v35 = vmax.f32 %v870_v22, 0.0  ;;  %v2702_v42 = vld [vmem:[%s2985_s5 + $0x38] sm:$0xff] }
 0x1fd   :  { %1866 = vmatprep.subr.mxu0 %v1042_v50  ;;  %v888_v12 = vadd.f32 %v887_v29, %v2553_v2  ;;  %v1080_v13 = vmax.f32 %v884_v14, 0.0  ;;  %v2689_v29 = vld [vmem:[%s2985_s5 + $0x30] sm:$0xff]  ;;  %v848_v4 = vadd.f32 %v2595_v59, %v2590_v46  ;;  %v2709_v14 = vld [vmem:[%s2985_s5 + $0x40] sm:$0xff]  ;;  %v840_v59 = vadd.f32 %v2581_v44, %v2598_v49 }
 0x1fe   :  { %v889_v55 = vpop.f32.mrf.mxu0  ;;  %1867 = vmatpush3.msra.mxu0 %v1042_v50  ;;  %v1076_v50 = vmax.f32 %v876_v11, 0.0  ;;  %v1074_v37 = vmax.f32 %v872_v47, 0.0  ;;  %v1067_v3 = vmax.f32 %v858_v24, 0.0  ;;  %v834_v44 = vadd.f32 %v2575_v19, %v2603_v8  ;;  %v2742_v19 = vld [vmem:[%s2985_s5 + $0x58] sm:$0xff] }
 0x1ff   :  { %v890_v0 = vadd.f32 %v889_v55, %v2553_v2  ;;  %1868 = vmatprep.subr.mxu0 %v1039_v30  ;;  %v1082_v26 = vmax.f32 %v888_v12, 0.0  ;;  %v2664_v2 = vld [vmem:[%s2985_s5 + $0x18] sm:$0xff]  ;;  %v1071_v12 = vmax.f32 %v866_v18, 0.0  ;;  %v1070_v55 = vmax.f32 %v864_v63, 0.0 }
 0x200   :  { %1869 = vmatpush3.msra.mxu0 %v1039_v30  ;;  %v854_v30 = vadd.f32 %v2605_v45, %v2583_v48  ;;  %v1068_v45 = vmax.f32 %v860_v31, 0.0  ;;  %v846_v48 = vadd.f32 %v2592_v39, %v2590_v46  ;;  %v2722_v46 = vld [vmem:[%s2985_s5 + $0x48] sm:$0xff]  ;;  %v836_v39 = vadd.f32 %v2579_v43, %v2603_v8 }
 0x201   :  { %v1083_v52 = vmax.f32 %v890_v0, 0.0  ;;  %1871 = vmatmul.mubr.f32.vlgmr.msra.gmra.mxu0 %v2647_v58  ;;  %v842_v0 = vadd.f32 %v2586_v27, %v2598_v49  ;;  %v1062_v27 = vmax.f32 %v848_v4, 0.0  ;;  %v830_v11 = vadd.f32 %v2571_v7, %v2611_v62 }
 0x202   :  { %1873 = vmatprep.mubr.f32.mxu0 %v2654_v5  ;;  %v1065_v6 = vmax.f32 %v854_v30, 0.0  ;;  %v1061_v49 = vmax.f32 %v846_v48, 0.0  ;;  %v828_v43 = vadd.f32 %v2569_v20, %v2611_v62  ;;  %v1058_v47 = vmax.f32 %v840_v59, 0.0 }
 0x203   :  { %1165 = vmatprep.subr.mxu1 %v1083_v52  ;;  %v2729_v52 = vld [vmem:[%s2985_s5 + $0x50] sm:$0xff]  ;;  %v824_v8 = vadd.f32 %v2565_v53, %v2616_v41  ;;  %v1056_v7 = vmax.f32 %v836_v39, 0.0  ;;  %v822_v20 = vadd.f32 %v2561_v34, %v2616_v41  ;;  %v1055_v62 = vmax.f32 %v834_v44, 0.0  ;;  %v110_v34 = vld [vmem:[%s2985_s5 + $0x68] sm:$0xff] }
 0x204   :  { %1166 = vmatpush1.msra.mxu1 %v1082_v26  ;;  %v1059_v26 = vmax.f32 %v842_v0, 0.0  ;;  %v818_v22 = vadd.f32 %v2559_v28, %v2625_v32  ;;  %v816_v53 = vadd.f32 %v2555_v23, %v2625_v32  ;;  %v1052_v18 = vmax.f32 %v828_v43, 0.0  ;;  %v111_v28 = vld [vmem:[%s2985_s5 + $0x70] sm:$0xff] }
 0x205   :  { %1167 = vmatprep.subr.mxu1 %v1080_v13  ;;  %1874 = vmatmul.mubr.f32.gmra.mxu0 %v2664_v2  ;;  %v2749_v13 = vld [vmem:[%s2985_s5 + $0x60] sm:$0xff]  ;;  %v812_v41 = vadd.f32 %v2549_v21, %v2629_v56  ;;  %v810_v23 = vadd.f32 %v2545_v17, %v2629_v56  ;;  %v1049_v32 = vmax.f32 %v822_v20, 0.0  ;;  %v806_v63 = vadd.f32 %v2541_v16, %v2635_v60 }
 0x206   :  { %1168 = vmatpush1.msra.mxu1 %v1079_v36  ;;  %1876 = vmatprep.mubr.f32.mxu0 %v2670_v33  ;;  %v1053_v36 = vmax.f32 %v830_v11, 0.0  ;;  %v804_v21 = vadd.f32 %v2537_v57, %v2635_v60  ;;  %v1046_v31 = vmax.f32 %v816_v53, 0.0  ;;  %v800_v17 = vadd.f32 %v2533_v10, %v2639_v25 }
 0x207   :  { %1169 = vmatprep.subr.mxu1 %v1077_v15  ;;  %v1050_v15 = vmax.f32 %v824_v8, 0.0  ;;  %v1044_v56 = vmax.f32 %v812_v41, 0.0  ;;  %v798_v16 = vadd.f32 %v2529_v9, %v2639_v25  ;;  %v1043_v24 = vmax.f32 %v810_v23, 0.0 }
 0x208   :  { %1170 = vmatpush1.msra.mxu1 %v1076_v50  ;;  %v1047_v50 = vmax.f32 %v818_v22, 0.0  ;;  %v1040_v57 = vmax.f32 %v804_v21, 0.0  ;;  %v1038_v60 = vmax.f32 %v800_v17, 0.0 }
 0x209   :  { %1171 = vmatprep.subr.mxu1 %v1074_v37  ;;  %1877 = vmatmul.mubr.f32.gmra.mxu0 %v2682_v40  ;;  %v112_v37 = vld [vmem:[%s2985_s5 + $0x78] sm:$0xff]  ;;  %v1037_v30 = vmax.f32 %v798_v16, 0.0 }
 0x20a   :  { %1172 = vmatpush1.msra.mxu1 %v1073_v35  ;;  %1879 = vmatprep.mubr.f32.mxu0 %v2689_v29  ;;  %v1041_v35 = vmax.f32 %v806_v63, 0.0 }
 0x20b   :  { %1173 = vmatprep.subr.mxu1 %v1071_v12  ;;  %v2831_v12 = vpop.permute.xlu0 %1162 }
 0x20c   :  { %1174 = vmatpush1.msra.mxu1 %v1070_v55 }
 0x20d   :  { %1175 = vmatprep.subr.mxu1 %v1068_v45  ;;  %1880 = vmatmul.mubr.f32.gmra.mxu0 %v2702_v42 }
 0x20e   :  { %1176 = vmatpush1.msra.mxu1 %v1067_v3  ;;  %1882 = vmatprep.mubr.f32.mxu0 %v2709_v14 }
 0x20f   :  { %1177 = vmatprep.subr.mxu1 %v1065_v6  ;;  %v2835_v45 = vpop.permute.xlu0 %1152 }
 0x210   :  { %1178 = vmatpush1.msra.mxu1 %v1064_v54 }
 0x211   :  { %1179 = vmatprep.subr.mxu1 %v1062_v27  ;;  %1883 = vmatmul.mubr.f32.gmra.mxu0 %v2722_v46 }
 0x212   :  { %1180 = vmatpush1.msra.mxu1 %v1061_v49  ;;  %1885 = vmatprep.mubr.f32.mxu0 %v2729_v52 }
 0x213   :  { %1181 = vmatprep.subr.mxu1 %v1059_v26  ;;  %v2839_v6 = vpop.permute.xlu0 %1142 }
 0x214   :  { %1182 = vmatpush1.msra.mxu1 %v1058_v47 }
 0x215   :  { %1183 = vmatprep.subr.mxu1 %v1056_v7  ;;  %1886 = vmatmul.mubr.f32.gmra.mxu0 %v2742_v19 }
 0x216   :  { %1184 = vmatpush1.msra.mxu1 %v1055_v62  ;;  %1888 = vmatprep.mubr.f32.mxu0 %v2749_v13 }
 0x217   :  { %1185 = vmatprep.subr.mxu1 %v1053_v36 }
 0x218   :  { %1186 = vmatpush1.msra.mxu1 %v1052_v18 }
 0x219   :  { %1187 = vmatprep.subr.mxu1 %v1050_v15  ;;  %1889 = vmatmul.mubr.f32.gmra.mxu0 %v110_v34 }
 0x21a   :  { %1188 = vmatpush1.msra.mxu1 %v1049_v32  ;;  %1891 = vmatprep.mubr.f32.mxu0 %v111_v28 }
 0x21b   :  { %1189 = vmatprep.subr.mxu1 %v1047_v50 }
 0x21c   :  { %1190 = vmatpush1.msra.mxu1 %v1046_v31 }
 0x21d   :  { %1191 = vmatprep.subr.mxu1 %v1044_v56  ;;  %1892 = vmatmul.mubr.f32.gmra.mxu0 %v112_v37 }
 0x21e   :  { %1192 = vmatpush1.msra.mxu1 %v1043_v24  ;;  %1588 = vmatprep.mubr.f32.mxu0 %v1979_v51 }
 0x21f   :  { %1193 = vmatprep.subr.mxu1 %v1041_v35 }
 0x220   :  { %1194 = vmatpush1.msra.mxu1 %v1040_v57 }
 0x221   :  { %1195 = vmatprep.subr.mxu1 %v1038_v60 }
 0x222   :  { %1196 = vmatpush1.msra.mxu1 %v1037_v30 }
 0x223   :  { %1230 = vmatmul.mubr.f32.vlgmr.msra.gmra.mxu1 %v2526_v61  ;;  %1894 = vmatprep.subr.mxu1 %v1979_v51  ;;  %v2811_v61 = vpop.permute.xlu1 %1157 }
 0x224   :  { %1235 = vmatprep.mubr.f32.mxu1 %v1979_v51 }
 0x227   :  { %1236 = vmatmul.mubr.f32.gmra.mxu1 %v2647_v58  ;;  %v2813_v9 = vpop.permute.xlu1 %1147 }
 0x228   :  { %1241 = vmatprep.mubr.f32.mxu1 %v1979_v51 }
 0x22b   :  { %1242 = vmatmul.mubr.f32.gmra.mxu1 %v2654_v5  ;;  %v2819_v58 = vpop.permute.xlu1 %1137 }
 0x22c   :  { %1247 = vmatprep.mubr.f32.mxu1 %v1979_v51 }
 0x22f   :  { %1248 = vmatmul.mubr.f32.gmra.mxu1 %v2664_v2 }
 0x230   :  { %1253 = vmatprep.mubr.f32.mxu1 %v1979_v51 }
 0x233   :  { %1254 = vmatmul.mubr.f32.gmra.mxu1 %v2670_v33 }
 0x234   :  { %1259 = vmatprep.mubr.f32.mxu1 %v1979_v51 }
 0x237   :  { %1260 = vmatmul.mubr.f32.gmra.mxu1 %v2682_v40  ;;  %v2827_v40 = vpop.permute.xlu1 %1127 }
 0x238   :  { %1265 = vmatprep.mubr.f32.mxu1 %v1979_v51 }
 0x23b   :  { %1266 = vmatmul.mubr.f32.gmra.mxu1 %v2689_v29 }
 0x23c   :  { %1271 = vmatprep.mubr.f32.mxu1 %v1979_v51 }
 0x23f   :  { %1272 = vmatmul.mubr.f32.gmra.mxu1 %v2702_v42  ;;  %v2833_v42 = vpop.permute.xlu1 %1117 }
 0x240   :  { %1277 = vmatprep.mubr.f32.mxu1 %v1979_v51 }
 0x243   :  { %1278 = vmatmul.mubr.f32.gmra.mxu1 %v2709_v14  ;;  %v2837_v3 = vpop.permute.xlu1 %1107 }
 0x244   :  { %1283 = vmatprep.mubr.f32.mxu1 %v1979_v51 }
 0x247   :  { %1284 = vmatmul.mubr.f32.gmra.mxu1 %v2722_v46  ;;  %v2841_v46 = vpop.permute.xlu1 %1097 }
 0x248   :  { %1289 = vmatprep.mubr.f32.mxu1 %v1979_v51 }
 0x24b   :  { %1290 = vmatmul.mubr.f32.gmra.mxu1 %v2729_v52  ;;  %v2844_v52 = vpop.permute.xlu0 %1132 }
 0x24c   :  { %1295 = vmatprep.mubr.f32.mxu1 %v1979_v51 }
 0x24f   :  { %1296 = vmatmul.mubr.f32.gmra.mxu1 %v2742_v19  ;;  %v2849_v19 = vpop.permute.xlu1 %1087  ;;  %v2856_v62 = vpop.permute.xlu0 %1122 }
 0x250   :  { %1301 = vmatprep.mubr.f32.mxu1 %v1979_v51 }
 0x253   :  { %1302 = vmatmul.mubr.f32.gmra.mxu1 %v2749_v13  ;;  %v2871_v63 = vpop.permute.xlu0 %1112 }
 0x254   :  { %1307 = vmatprep.mubr.f32.mxu1 %v1979_v51 }
 0x257   :  { %1308 = vmatmul.mubr.f32.gmra.mxu1 %v110_v34  ;;  %v2886_v57 = vpop.permute.xlu0 %1102 }
 0x258   :  { %1313 = vmatprep.mubr.f32.mxu1 %v1979_v51 }
 0x25b   :  { %1314 = vmatmul.mubr.f32.gmra.mxu1 %v111_v28 }
 0x25c   :  { %1319 = vmatprep.mubr.f32.mxu1 %v1979_v51 }
 0x25f   :  { %1320 = vmatmul.mubr.f32.gmra.mxu1 %v112_v37 }
 0x260   :  { %1926 = vmatprep.mubr.msk.f32.mxu1 %vm1980_vm0, %v1979_v51 }
 0x2c1   :  { %v2815_v10 = vpop.f32.mrf.mxu0 }
 0x2c3   :  { %v2817_v25 = vpop.f32.mrf.mxu0 }
 0x2c5   :  { %v2821_v5 = vpop.f32.mrf.mxu0 }
 0x2c7   :  { %v2823_v2 = vpop.f32.mrf.mxu0 }
 0x2c9   :  { %v2825_v33 = vpop.f32.mrf.mxu0 }
 0x2ca   :  { %v1418_v24 = vadd.f32 %v2825_v33, %v2871_v63  ;;  %v1408_v33 = vadd.f32 %v2821_v5, %v2886_v57 }
 0x2cb   :  { %v2829_v29 = vpop.f32.mrf.mxu0 }
 0x2cc   :  { %v1413_v30 = vadd.f32 %v2829_v29, %v2837_v3  ;;  %v2903_v29 = vpop.permute.xlu0 %1092 }
 0x2cd   :  { %v1881_v38 = vpop.f32.mrf.mxu0  ;;  %v1398_v5 = vadd.f32 %v2815_v10, %v2903_v29 }
 0x2ce   :  { %v1428_v21 = vadd.f32 %v1881_v38, %v2856_v62 }
 0x2cf   :  { %v1422_v55 = vpop.f32.mrf.mxu0 }
 0x2d0   :  { %v1423_v17 = vadd.f32 %v1422_v55, %v2833_v42  ;;  %v1494_v35 = vmax.f32 %v1428_v21, 0.0 }
 0x2d1   :  { %v1884_v4 = vpop.f32.mrf.mxu0 }
 0x2d2   :  { %v1438_v41 = vadd.f32 %v1884_v4, %v2844_v52  ;;  %v1491_v38 = vmax.f32 %v1423_v17, 0.0  ;;  %v1488_v4 = vmax.f32 %v1418_v24, 0.0 }
 0x2d3   :  { %v1432_v14 = vpop.f32.mrf.mxu0 }
 0x2d4   :  { %v1433_v23 = vadd.f32 %v1432_v14, %v2827_v40  ;;  %v1500_v31 = vmax.f32 %v1438_v41, 0.0 }
 0x2d5   :  { %v1887_v48 = vpop.f32.mrf.mxu0 }
 0x2d6   :  { %v1448_v7 = vadd.f32 %v1887_v48, %v2839_v6  ;;  %v1497_v56 = vmax.f32 %v1433_v23, 0.0  ;;  %v1403_v48 = vadd.f32 %v2823_v2, %v2841_v46  ;;  %v1393_v2 = vadd.f32 %v2817_v25, %v2849_v19 }
 0x2d7   :  { %v1442_v0 = vpop.f32.mrf.mxu0 }
 0x2d8   :  { %v1443_v36 = vadd.f32 %v1442_v0, %v2819_v58  ;;  %v1506_v15 = vmax.f32 %v1448_v7, 0.0  ;;  %v1485_v0 = vmax.f32 %v1413_v30, 0.0  ;;  %v1473_v10 = vmax.f32 %v1393_v2, 0.0 }
 0x2d9   :  { %v1890_v59 = vpop.f32.mrf.mxu0 }
 0x2da   :  { %v1458_v49 = vadd.f32 %v1890_v59, %v2835_v45  ;;  %v1503_v32 = vmax.f32 %v1443_v36, 0.0 }
 0x2db   :  { %v1452_v54 = vpop.f32.mrf.mxu0 }
 0x2dc   :  { %v1453_v43 = vadd.f32 %v1452_v54, %v2813_v9  ;;  %v1512_v13 = vmax.f32 %v1458_v49, 0.0  ;;  %v1482_v54 = vmax.f32 %v1408_v33, 0.0  ;;  %v1476_v49 = vmax.f32 %v1398_v5, 0.0 }
 0x2dd   :  { %v1893_v39 = vpop.f32.mrf.mxu0 }
 0x2de   :  { %v1468_v27 = vadd.f32 %v1893_v39, %v2831_v12  ;;  %v1509_v53 = vmax.f32 %v1453_v43, 0.0 }
 0x2df   :  { %v1462_v44 = vpop.f32.mrf.mxu0 }
 0x2e0   :  { %v1518_v11 = vmax.f32 %v1468_v27, 0.0  ;;  %v1463_v26 = vadd.f32 %v1462_v44, %v2811_v61  ;;  %v1479_v27 = vmax.f32 %v1403_v48, 0.0 }
 0x2e2   :  { %v1515_v47 = vmax.f32 %v1463_v26, 0.0  ;;  %1895 = vmatpush3.msra.mxu1 %v1518_v11  ;;  %v2924_v26 = vld [vmem:[%s2987_s7] sm:$0x3]  ;;  %s1982_s7 = smov [#allocation2]  }
 0x2e3   :  { %v1231_v8 = vpop.f32.mrf.mxu1  ;;  %1896 = vmatprep.subr.mxu1 %v1979_v51  ;;  %s1693_s15 = sshll.u32 %s1982_s7, 4  ;;  %s1694_s15 = int_to_ptr.vmem [resolvable:$true] %s1693_s15 }
 0x2e4   :  { %v2854_v20 = vadd.f32 %v1231_v8, %v2849_v19  ;;  %1897 = vmatpush3.msra.mxu1 %v1515_v47  ;;  %s1955_s17 = scalar_lea.vmem %s1694_s15, 96  ;;  %p1960_p1 = scmp.lt.s32.totalorder %s1694_s15, %s1694_s15 }
 0x2e5   :  { %v1233_v22 = vpop.f32.mrf.mxu1  ;;  %1898 = vmatprep.subr.mxu1 %v1979_v51  ;;  %p1956_p0 = scmp.ne.s32.totalorder %s1694_s15, %s1955_s17  ;;  %p1961_p2 = scmp.lt.s32.totalorder %s1955_s17, %s1955_s17 }
 0x2e6   :  { %v2861_v18 = vadd.f32 %v1233_v22, %v2849_v19  ;;  %1899 = vmatpush3.msra.mxu1 %v1512_v13 }
 0x2e7   :  { %v2863_v34 = vpop.f32.mrf.mxu1  ;;  %1900 = vmatprep.subr.mxu1 %v1979_v51  ;;  %p1962_p3 = por %p1961_p2, %p1960_p1 }
 0x2e8   :  { %1901 = vmatpush3.msra.mxu1 %v1509_v53 }
 0x2e9   :  { %v2867_v28 = vpop.f32.mrf.mxu1  ;;  %1902 = vmatprep.subr.mxu1 %v1979_v51  ;;  %p1963_p4 = pnand %p1962_p3, %p1956_p0 }
 0x2ea   :  { %1903 = vmatpush3.msra.mxu1 %v1506_v15 }
 0x2eb   :  { %v2873_v50 = vpop.f32.mrf.mxu1  ;;  %1904 = vmatprep.subr.mxu1 %v1979_v51 }
 0x2ec   :  { %1905 = vmatpush3.msra.mxu1 %v1503_v32 }
 0x2ed   :  { %v2877_v37 = vpop.f32.mrf.mxu1  ;;  %1906 = vmatprep.subr.mxu1 %v1979_v51 }
 0x2ee   :  { %1907 = vmatpush3.msra.mxu1 %v1500_v31 }
 0x2ef   :  { %v2881_v16 = vpop.f32.mrf.mxu1  ;;  %1908 = vmatprep.subr.mxu1 %v1979_v51 }
 0x2f0   :  { %1909 = vmatpush3.msra.mxu1 %v1497_v56 }
 0x2f1   :  { %v2888_v60 = vpop.f32.mrf.mxu1  ;;  %1910 = vmatprep.subr.mxu1 %v1979_v51 }
 0x2f2   :  { %1911 = vmatpush3.msra.mxu1 %v1494_v35 }
 0x2f3   :  { %v2893_v55 = vpop.f32.mrf.mxu1  ;;  %1912 = vmatprep.subr.mxu1 %v1979_v51 }
 0x2f4   :  { %1913 = vmatpush3.msra.mxu1 %v1491_v38 }
 0x2f5   :  { %v2898_v14 = vpop.f32.mrf.mxu1  ;;  %1914 = vmatprep.subr.mxu1 %v1979_v51 }
 0x2f6   :  { %1915 = vmatpush3.msra.mxu1 %v1488_v4 }
 0x2f7   :  { %v2905_v59 = vpop.f32.mrf.mxu1  ;;  %1916 = vmatprep.subr.mxu1 %v1979_v51 }
 0x2f8   :  { %1917 = vmatpush3.msra.mxu1 %v1485_v0 }
 0x2f9   :  { %v2910_v39 = vpop.f32.mrf.mxu1  ;;  %1918 = vmatprep.subr.mxu1 %v1979_v51 }
 0x2fa   :  { %1919 = vmatpush3.msra.mxu1 %v1482_v54 }
 0x2fb   :  { %v2915_v44 = vpop.f32.mrf.mxu1  ;;  %1920 = vmatprep.subr.mxu1 %v1979_v51 }
 0x2fc   :  { %1921 = vmatpush3.msra.mxu1 %v1479_v27 }
 0x2fd   :  { %v2918_v11 = vpop.f32.mrf.mxu1  ;;  %1922 = vmatprep.subr.mxu1 %v1979_v51 }
 0x2fe   :  { %1923 = vmatpush3.msra.mxu1 %v1476_v49 }
 0x2ff   :  { %v1273_v25 = vpop.f32.mrf.mxu1  ;;  %1924 = vmatprep.subr.mxu1 %v1979_v51 }
 0x300   :  { %1925 = vmatpush3.msra.mxu1 %v1473_v10 }
 0x301   :  { %v1275_v43 = vpop.f32.mrf.mxu1  ;;  %1927 = vmatmul.mubr.f32.vlgmr.msra.gmra.mxu1 %v2924_v26 }
 0x303   :  { %v1279_v47 = vpop.f32.mrf.mxu1 }
 0x305   :  { %v1281_v19 = vpop.f32.mrf.mxu1 }
 0x307   :  { %v1285_v8 = vpop.f32.mrf.mxu1 }
 0x309   :  { %v1287_v7 = vpop.f32.mrf.mxu1 }
 0x30b   :  { %v1291_v13 = vpop.f32.mrf.mxu1 }
 0x30d   :  { %v1293_v22 = vpop.f32.mrf.mxu1 }
 0x30e   :  { %v1294_v10 = vadd.f32 %v1293_v22, %v2819_v58  ;;  %v1280_v22 = vadd.f32 %v1279_v47, %v2827_v40 }
 0x30f   :  { %v1297_v36 = vpop.f32.mrf.mxu1 }
 0x311   :  { %v1299_v53 = vpop.f32.mrf.mxu1 }
 0x312   :  { %v1300_v27 = vadd.f32 %v1299_v53, %v2839_v6  ;;  %v1286_v53 = vadd.f32 %v1285_v8, %v2844_v52 }
 0x313   :  { %v1303_v41 = vpop.f32.mrf.mxu1 }
 0x314   :  { %v1304_v54 = vadd.f32 %v1303_v41, %v2813_v9  ;;  %v1505_v41 = vmax.f32 %v1300_v27, 0.0 }
 0x315   :  { %v1305_v15 = vpop.f32.mrf.mxu1 }
 0x316   :  { %v1306_v0 = vadd.f32 %v1305_v15, %v2813_v9  ;;  %v1292_v15 = vadd.f32 %v1291_v13, %v2819_v58  ;;  %v1288_v9 = vadd.f32 %v1287_v7, %v2844_v52  ;;  %v1276_v58 = vadd.f32 %v1275_v43, %v2856_v62 }
 0x317   :  { %v1309_v23 = vpop.f32.mrf.mxu1  ;;  %v1274_v7 = vadd.f32 %v1273_v25, %v2856_v62  ;;  %v1270_v52 = vadd.f32 %v2918_v11, %v2833_v42  ;;  %v1262_v62 = vadd.f32 %v2905_v59, %v2871_v63  ;;  %v1258_v11 = vadd.f32 %v2898_v14, %v2837_v3 }
 0x318   :  { %v1310_v4 = vadd.f32 %v1309_v23, %v2835_v45  ;;  %v1507_v23 = vmax.f32 %v1304_v54, 0.0  ;;  %v1499_v13 = vmax.f32 %v1288_v9, 0.0  ;;  %v1493_v43 = vmax.f32 %v1276_v58, 0.0 }
 0x319   :  { %v1311_v32 = vpop.f32.mrf.mxu1  ;;  %v1492_v25 = vmax.f32 %v1274_v7, 0.0  ;;  %v1490_v47 = vmax.f32 %v1270_v52, 0.0  ;;  %v1486_v59 = vmax.f32 %v1262_v62, 0.0  ;;  %v1246_v14 = vadd.f32 %v2877_v37, %v2841_v46 }
 0x31a   :  { %v1312_v38 = vadd.f32 %v1311_v32, %v2835_v45  ;;  %v1508_v45 = vmax.f32 %v1306_v0, 0.0  ;;  %v1522_v0 = vpop.permute.xlu0 %1521 }
 0x31b   :  { %v1315_v21 = vpop.f32.mrf.mxu1 }
 0x31c   :  { %v1316_v30 = vadd.f32 %v1315_v21, %v2811_v61  ;;  %v1511_v49 = vmax.f32 %v1312_v38, 0.0  ;;  %v1501_v21 = vmax.f32 %v1292_v15, 0.0 }
 0x31d   :  { %v1317_v31 = vpop.f32.mrf.mxu1 }
 0x31e   :  { %v1318_v24 = vadd.f32 %v1317_v31, %v2811_v61  ;;  %v1513_v2 = vmax.f32 %v1316_v30, 0.0  ;;  %v1298_v61 = vadd.f32 %v1297_v36, %v2839_v6  ;;  %v1282_v6 = vadd.f32 %v1281_v19, %v2827_v40 }
 0x31f   :  { %v1321_v17 = vpop.f32.mrf.mxu1  ;;  %v1502_v36 = vmax.f32 %v1294_v10, 0.0  ;;  %v1498_v31 = vmax.f32 %v1286_v53, 0.0  ;;  %v1268_v19 = vadd.f32 %v2915_v44, %v2833_v42  ;;  %v1264_v40 = vadd.f32 %v2910_v39, %v2871_v63 }
 0x320   :  { %v1322_v51 = vadd.f32 %v1321_v17, %v2831_v12  ;;  %v1514_v5 = vmax.f32 %v1318_v24, 0.0  ;;  %v1504_v32 = vmax.f32 %v1298_v61, 0.0  ;;  %v1496_v8 = vmax.f32 %v1282_v6, 0.0 }
 0x321   :  { %v1323_v56 = vpop.f32.mrf.mxu1  ;;  %v1495_v17 = vmax.f32 %v1280_v22, 0.0  ;;  %v1256_v42 = vadd.f32 %v2893_v55, %v2837_v3  ;;  %v1489_v44 = vmax.f32 %v1268_v19, 0.0  ;;  %v1252_v39 = vadd.f32 %v2888_v60, %v2886_v57 }
 0x322   :  { %v1324_v35 = vadd.f32 %v1323_v56, %v2831_v12  ;;  %v1516_v48 = vmax.f32 %v1322_v51, 0.0  ;;  %v1510_v12 = vmax.f32 %v1310_v4, 0.0  ;;  %v1487_v51 = vmax.f32 %v1264_v40, 0.0 }
 0x323   :  { %v1250_v63 = vadd.f32 %v2881_v16, %v2886_v57  ;;  %v1484_v56 = vmax.f32 %v1258_v11, 0.0  ;;  %v1244_v3 = vadd.f32 %v2873_v50, %v2841_v46  ;;  %v1483_v55 = vmax.f32 %v1256_v42, 0.0 }
 0x324   :  { %v1517_v33 = vmax.f32 %v1324_v35, 0.0  ;;  %v1240_v60 = vadd.f32 %v2867_v28, %v2903_v29  ;;  %v1481_v24 = vmax.f32 %v1252_v39, 0.0  ;;  %v1238_v16 = vadd.f32 %v2863_v34, %v2903_v29 }
 0x325   :  { %v1480_v57 = vmax.f32 %v1250_v63, 0.0  ;;  %v1478_v35 = vmax.f32 %v1246_v14, 0.0  ;;  %v1477_v37 = vmax.f32 %v1244_v3, 0.0  ;;  %v1472_v46 = vmax.f32 %v2861_v18, 0.0 }
 0x326   :  { %1524 = vmatprep.subr.mxu0 %v1517_v33  ;;  %v1475_v30 = vmax.f32 %v1240_v60, 0.0  ;;  %v1474_v38 = vmax.f32 %v1238_v16, 0.0  ;;  %v1471_v28 = vmax.f32 %v2854_v20, 0.0  ;;  %v1981_v29 = vmov 1983009808  }
 0x327   :  { %1525 = vmatpush1.msra.mxu0 %v1516_v48  ;;  %v1670_v33 = vunpack.c.l.s4 %v1981_v29 }
 0x328   :  { %1526 = vmatprep.subr.mxu0 %v1514_v5 }
 0x329   :  { %1527 = vmatpush1.msra.mxu0 %v1513_v2  ;;  %v1671_v4 = vunpack.c.0.s8 %v1670_v33 }
 0x32a   :  { %1528 = vmatprep.subr.mxu0 %v1511_v49 }
 0x32b   :  { %1529 = vmatpush1.msra.mxu0 %v1510_v12  ;;  %v1674_v2 = vsub.s32 %v1671_v4, %v2237_v1 }
 0x32c   :  { %1530 = vmatprep.subr.mxu0 %v1508_v45 }
 0x32d   :  { %1531 = vmatpush1.msra.mxu0 %v1507_v23 }
 0x32e   :  { %1532 = vmatprep.subr.mxu0 %v1505_v41 }
 0x32f   :  { %1533 = vmatpush1.msra.mxu0 %v1504_v32 }
 0x330   :  { %1534 = vmatprep.subr.mxu0 %v1502_v36 }
 0x331   :  { %1535 = vmatpush1.msra.mxu0 %v1501_v21 }
 0x332   :  { %1536 = vmatprep.subr.mxu0 %v1499_v13 }
 0x333   :  { %1537 = vmatpush1.msra.mxu0 %v1498_v31 }
 0x334   :  { %1538 = vmatprep.subr.mxu0 %v1496_v8 }
 0x335   :  { %1539 = vmatpush1.msra.mxu0 %v1495_v17 }
 0x336   :  { %1540 = vmatprep.subr.mxu0 %v1493_v43 }
 0x337   :  { %1541 = vmatpush1.msra.mxu0 %v1492_v25 }
 0x338   :  { %1542 = vmatprep.subr.mxu0 %v1490_v47 }
 0x339   :  { %1543 = vmatpush1.msra.mxu0 %v1489_v44 }
 0x33a   :  { %1544 = vmatprep.subr.mxu0 %v1487_v51 }
 0x33b   :  { %1545 = vmatpush1.msra.mxu0 %v1486_v59 }
 0x33c   :  { %1546 = vmatprep.subr.mxu0 %v1484_v56 }
 0x33d   :  { %1547 = vmatpush1.msra.mxu0 %v1483_v55 }
 0x33e   :  { %1548 = vmatprep.subr.mxu0 %v1481_v24 }
 0x33f   :  { %1549 = vmatpush1.msra.mxu0 %v1480_v57 }
 0x340   :  { %1550 = vmatprep.subr.mxu0 %v1478_v35 }
 0x341   :  { %1551 = vmatpush1.msra.mxu0 %v1477_v37 }
 0x342   :  { %1552 = vmatprep.subr.mxu0 %v1475_v30 }
 0x343   :  { %1553 = vmatpush1.msra.mxu0 %v1474_v38 }
 0x344   :  { %1554 = vmatprep.subr.mxu0 %v1472_v46 }
 0x345   :  { %1555 = vmatpush1.msra.mxu0 %v1471_v28 }
 0x346   :  { %1589 = vmatmul.mubr.f32.vlgmr.msra.gmra.mxu0 %v2924_v26  ;;  %v1954_v26 = vld [vmem:[%s2980_s0] sm:$0x3f] }
 0x3c1   :  { %v1661_v34 = vpop.f32.mrf.mxu1 }
 0x3c2   :  { %v1662_v54 = vadd.f32 %v1661_v34, %v1522_v0 }
 0x3c3   :  { %v1928_v50 = vpop.f32.mrf.mxu1 }
 0x3c4   :  { %v1682_v20 = vrot.slane %v1662_v54, %v1674_v2 }
 0x406   :  { %v1590_v48 = vpop.f32.mrf.mxu0 }
 0x407   :  { %v1591_v18 = vadd.f32 %v1590_v48, %v1522_v0 }
 0x408   :  { %v1592_v5 = vpop.f32.mrf.mxu0 }
 0x409   :  { %v1593_v27 = vadd.f32 %v1592_v5, %v1522_v0 }
 0x40b   :  { %v1668_v49 = vcombine.low %v1591_v18, %v1593_v27 }
 0x40d   :  { %v1675_v61 = vrot.slane %v1668_v49, %v1674_v2 }
 0x40f   :  { %v1683_v12 = vcombine.low %v1675_v61, %v1682_v20 }
 0x411   :  { %v1685_v10 = vadd.f32 %v1954_v26, %v1683_v12 }
 0x413   :  { %1686 = vst [vmem:[#allocation2] sm:$0x3f] %v1685_v10 }
 0x414   :  { %1966 = shalt.err (!%p1963_p4)
}
 0x415   :  { %1696 = dma.vmem_to_hbm [thread:$0]  %s1694_s15, 96, %s2989_s9, [#allocation3]  }
 0x416   :  { %1975 = dma.done.wait [#allocation3], 96  }
 0x417   :  { %1976 = vsyncadd [#allocation3], 4294967200 }
 0x418   :  { %1700 = vsyncpa [#allocation3], 1 }

</bundles_post_ra>
